<compile_context>
chip_gen: v6e
topology: v6e:2x2x1
jax: 0.10.0
libtpu: 0.0.40
codegen_flags: <defaults>
</compile_context>

<pallas_src>
import jax
import jax.numpy as jnp
from jax.experimental import pallas as pl
from jax.experimental.pallas import tpu as pltpu


def _round_up(x, m):
    return ((x + m - 1) // m) * m


def _ffn_swiglu_kernel(x_ref, w1_ref, w3_ref, w2_ref, o_ref, acc_ref):
    # grid = (token_tiles, hidden_tiles); axis 1 (hidden) is the reduction axis.
    k = pl.program_id(1)

    @pl.when(k == 0)
    def _init():
        acc_ref[...] = jnp.zeros_like(acc_ref)

    x = x_ref[...]                                                       # (tm, dim)
    h1 = jnp.dot(x, w1_ref[...], preferred_element_type=jnp.float32)    # (tm, th)
    h3 = jnp.dot(x, w3_ref[...], preferred_element_type=jnp.float32)    # (tm, th)
    gated = (h1 * jax.nn.sigmoid(h1)) * h3                               # silu(xw1)*(xw3)
    # Feed the MXU in the activation dtype (bf16 in production); accumulate in f32.
    acc_ref[...] += jnp.dot(gated.astype(x_ref.dtype), w2_ref[...],
                            preferred_element_type=jnp.float32)          # (tm, dim)

    @pl.when(k == pl.num_programs(1) - 1)
    def _finalize():
        o_ref[...] = acc_ref[...].astype(o_ref.dtype)


def feedforward_swiglu(x, w1t, w2t, w3t, *, tm=256, th=None, vmem_limit_bytes=None):
    """SwiGLU FFN:  out = (silu(x @ w1t) * (x @ w3t)) @ w2t.

    x:   (B, S, dim)
    w1t: (dim, hidden)  == PyTorch w1.weight.T  (transpose done ONCE by caller)
    w3t: (dim, hidden)  == PyTorch w3.weight.T
    w2t: (hidden, dim)  == PyTorch w2.weight.T
    """
    B, S, dim = x.shape
    hidden = w1t.shape[1]
    assert w1t.shape == (dim, hidden)
    assert w3t.shape == (dim, hidden)
    assert w2t.shape == (hidden, dim)

    M = B * S
    x2d = x.reshape(M, dim)  # zero-copy flatten

    # Token (row) tile: multiple of 8 sublanes; pad tokens to a tile multiple.
    tm = max(8, min(tm, _round_up(M, 8)))
    tm = _round_up(tm, 8)
    Mp = _round_up(M, tm)
    if Mp != M:
        x2d = jnp.pad(x2d, ((0, Mp - M), (0, 0)))

    # Hidden tile: the whole hidden dim if small, else a 128-multiple divisor.
    # (Sized so x/w1/w3/w2 tiles ×2 (double buffer) + the f32 accumulator stay
    # well inside the v7x 64 MiB VMEM budget at production dims.)
    if th is None:
        if hidden <= 512:
            th = hidden
        else:
            th = hidden
            for cand in (512, 384, 256, 128):
                if hidden % cand == 0:
                    th = cand
                    break
    assert hidden % th == 0, "hidden tile must divide hidden"
    assert th == hidden or th % 128 == 0, "hidden tile must be lane-aligned"
    n_k = hidden // th

    grid = (Mp // tm, n_k)

    cost = pl.CostEstimate(
        flops=6 * Mp * dim * hidden,          # three matmuls of 2*M*dim*hidden
        transcendentals=Mp * hidden,          # sigmoid in the gate
        bytes_accessed=int(
            (x2d.size + w1t.size + w3t.size + w2t.size + Mp * dim)
            * jnp.dtype(x.dtype).itemsize),
    )

    compiler_params = pltpu.CompilerParams(
        dimension_semantics=("parallel", "arbitrary"),
        vmem_limit_bytes=vmem_limit_bytes,
    )

    out2d = pl.pallas_call(
        _ffn_swiglu_kernel,
        out_shape=jax.ShapeDtypeStruct((Mp, dim), x.dtype),
        grid_spec=pltpu.PrefetchScalarGridSpec(
            num_scalar_prefetch=0,
            grid=grid,
            in_specs=[
                pl.BlockSpec((tm, dim), lambda i, k: (i, 0)),   # x row tile (k-invariant)
                pl.BlockSpec((dim, th), lambda i, k: (0, k)),   # w1.T hidden tile
                pl.BlockSpec((dim, th), lambda i, k: (0, k)),   # w3.T hidden tile
                pl.BlockSpec((th, dim), lambda i, k: (k, 0)),   # w2.T hidden tile
            ],
            out_specs=pl.BlockSpec((tm, dim), lambda i, k: (i, 0)),
            scratch_shapes=[pltpu.VMEM((tm, dim), jnp.float32)],
        ),
        compiler_params=compiler_params,
        cost_estimate=cost,
    )(x2d, w1t, w3t, w2t)

    if Mp != M:
        out2d = out2d[:M]
    return out2d.reshape(B, S, dim)


def _reference(x, w1, w2, w3):
    # Pure-JAX reference matching the PyTorch module exactly (PyTorch (out,in) weights).
    h1 = jnp.einsum("bsd,hd->bsh", x, w1)
    h3 = jnp.einsum("bsd,hd->bsh", x, w3)
    g = (h1 * jax.nn.sigmoid(h1)) * h3
    return jnp.einsum("bsh,dh->bsd", g, w2)


if __name__ == "__main__":
    # GPTBlock's FFN config: FeedForward(d_model, 4*d_model, multiple_of=192).
    d_model = 128                  # lane-aligned output dim (multiple of 128)
    hidden_dim_arg = 4 * d_model   # 512
    multiple_of = 192
    hidden = int(2 * hidden_dim_arg / 3)                                # 341
    hidden = multiple_of * ((hidden + multiple_of - 1) // multiple_of)  # 384

    key = jax.random.PRNGKey(0)
    kx, k1, k2, k3 = jax.random.split(key, 4)

    # Deterministic synthetic weights in PyTorch nn.Linear layout (out, in).
    w1 = jax.random.normal(k1, (hidden, d_model), dtype=jnp.float32) * 0.05
    w2 = jax.random.normal(k2, (d_model, hidden), dtype=jnp.float32) * 0.05
    w3 = jax.random.normal(k3, (hidden, d_model), dtype=jnp.float32) * 0.05
    # Pre-transpose ONCE (amortized to zero per call) to (in, out) layout.
    w1t, w2t, w3t = w1.T, w2.T, w3.T

    # Case 1: tile-aligned token count, default tiles (single hidden tile).
    B, S = 2, 128
    x = jax.random.normal(kx, (B, S, d_model), dtype=jnp.float32)
    out = jax.block_until_ready(feedforward_swiglu(x, w1t, w2t, w3t))
    ref = _reference(x, w1, w2, w3)
    assert out.shape == (B, S, d_model)
    assert jnp.allclose(out, ref, atol=1e-4, rtol=1e-4), "case 1 mismatch"

    # Case 2: token count NOT a multiple of the row tile (exercises padding)
    # and th=128 (exercises the hidden-axis accumulator across 3 steps).
    B2, S2 = 2, 200
    x2 = jax.random.normal(kx, (B2, S2, d_model), dtype=jnp.float32)
    out2 = jax.block_until_ready(
        feedforward_swiglu(x2, w1t, w2t, w3t, tm=256, th=128))
    ref2 = _reference(x2, w1, w2, w3)
    assert out2.shape == (B2, S2, d_model)
    assert jnp.allclose(out2, ref2, atol=1e-4, rtol=1e-4), "case 2 mismatch"

    print("KERNEL_OK")
</pallas_src>

<mosaic_0001>
module attributes {stable_mosaic.version = 11 : i64} {
  func.func @_ffn_swiglu_kernel(%arg0: i32, %arg1: i32, %arg2: memref<256x128xf32, #tpu.memory_space<vmem>>, %arg3: memref<128x384xf32, #tpu.memory_space<vmem>>, %arg4: memref<128x384xf32, #tpu.memory_space<vmem>>, %arg5: memref<384x128xf32, #tpu.memory_space<vmem>>, %arg6: memref<256x128xf32, #tpu.memory_space<vmem>>, %arg7: memref<256x128xf32, #tpu.memory_space<vmem>>) attributes {dimension_semantics = [#tpu.dimension_semantics<parallel>, #tpu.dimension_semantics<arbitrary>], iteration_bounds = array<i64: 1, 1>, scalar_prefetch = 0 : i64, scratch_operands = 1 : i64, tpu.core_type = #tpu.core_type<tc>, window_params = [{transform_indices = @transform_0, window_bounds = array<i64: 256, 128>}, {transform_indices = @transform_1, window_bounds = array<i64: 128, 384>}, {transform_indices = @transform_2, window_bounds = array<i64: 128, 384>}, {transform_indices = @transform_3, window_bounds = array<i64: 384, 128>}, {transform_indices = @transform_4, window_bounds = array<i64: 256, 128>}]} {
    %c0_i32 = arith.constant 0 : i32
    %0 = arith.cmpi eq, %arg1, %c0_i32 : i32
    %1 = arith.extui %0 : i1 to i32
    %c0_i32_0 = arith.constant 0 : i32
    %2 = arith.cmpi ne, %1, %c0_i32_0 : i32
    scf.if %2 {
      %cst_17 = arith.constant 0.000000e+00 : f32
      %23 = vector.broadcast %cst_17 : f32 to vector<256x128xf32>
      %c0_18 = arith.constant 0 : index
      %c0_19 = arith.constant 0 : index
      %24 = vector.load %arg7[%c0_18, %c0_19] : memref<256x128xf32, #tpu.memory_space<vmem>>, vector<256x128xf32>
      tpu.vector_store %arg7[%c0_18, %c0_19], %23 {strides = array<i32>} : memref<256x128xf32, #tpu.memory_space<vmem>>, vector<256x128xf32>,
    } else {
    }
    %c0 = arith.constant 0 : index
    %c0_1 = arith.constant 0 : index
    %3 = vector.load %arg2[%c0, %c0_1] : memref<256x128xf32, #tpu.memory_space<vmem>>, vector<256x128xf32>
    %c0_2 = arith.constant 0 : index
    %c0_3 = arith.constant 0 : index
    %4 = vector.load %arg3[%c0_2, %c0_3] : memref<128x384xf32, #tpu.memory_space<vmem>>, vector<128x384xf32>
    %cst = arith.constant dense<0.000000e+00> : vector<256x384xf32>
    %5 = tpu.matmul %3, %4, %cst {dimension_numbers = #tpu.dot_dimension_numbers<[1], [0], [0], [1], [0, 0, 1, 1], [], []>} : vector<256x128xf32>, vector<128x384xf32>, vector<256x384xf32> -> vector<256x384xf32>
    %c0_4 = arith.constant 0 : index
    %c0_5 = arith.constant 0 : index
    %6 = vector.load %arg4[%c0_4, %c0_5] : memref<128x384xf32, #tpu.memory_space<vmem>>, vector<128x384xf32>
    %cst_6 = arith.constant dense<0.000000e+00> : vector<256x384xf32>
    %7 = tpu.matmul %3, %6, %cst_6 {dimension_numbers = #tpu.dot_dimension_numbers<[1], [0], [0], [1], [0, 0, 1, 1], [], []>} : vector<256x128xf32>, vector<128x384xf32>, vector<256x384xf32> -> vector<256x384xf32>
    %8 = arith.negf %5 : vector<256x384xf32>
    %9 = math.exp %8 : vector<256x384xf32>
    %cst_7 = arith.constant 1.000000e+00 : f32
    %10 = vector.broadcast %cst_7 : f32 to vector<256x384xf32>
    %11 = arith.addf %10, %9 : vector<256x384xf32>
    %12 = arith.divf %10, %11 : vector<256x384xf32>
    %13 = arith.mulf %5, %12 : vector<256x384xf32>
    %14 = arith.mulf %13, %7 : vector<256x384xf32>
    %c0_8 = arith.constant 0 : index
    %c0_9 = arith.constant 0 : index
    %15 = vector.load %arg7[%c0_8, %c0_9] : memref<256x128xf32, #tpu.memory_space<vmem>>, vector<256x128xf32>
    %c0_10 = arith.constant 0 : index
    %c0_11 = arith.constant 0 : index
    %16 = vector.load %arg5[%c0_10, %c0_11] : memref<384x128xf32, #tpu.memory_space<vmem>>, vector<384x128xf32>
    %cst_12 = arith.constant dense<0.000000e+00> : vector<256x128xf32>
    %17 = tpu.matmul %14, %16, %cst_12 {dimension_numbers = #tpu.dot_dimension_numbers<[1], [0], [0], [1], [0, 0, 1, 1], [], []>} : vector<256x384xf32>, vector<384x128xf32>, vector<256x128xf32> -> vector<256x128xf32>
    %18 = arith.addf %15, %17 : vector<256x128xf32>
    %c0_13 = arith.constant 0 : index
    %c0_14 = arith.constant 0 : index
    %19 = vector.load %arg7[%c0_13, %c0_14] : memref<256x128xf32, #tpu.memory_space<vmem>>, vector<256x128xf32>
    tpu.vector_store %arg7[%c0_13, %c0_14], %18 {strides = array<i32>} : memref<256x128xf32, #tpu.memory_space<vmem>>, vector<256x128xf32>,
    %c0_i32_15 = arith.constant 0 : i32
    %20 = arith.cmpi eq, %arg1, %c0_i32_15 : i32
    %21 = arith.extui %20 : i1 to i32
    %c0_i32_16 = arith.constant 0 : i32
    %22 = arith.cmpi ne, %21, %c0_i32_16 : i32
    scf.if %22 {
      %c0_17 = arith.constant 0 : index
      %c0_18 = arith.constant 0 : index
      %23 = vector.load %arg7[%c0_17, %c0_18] : memref<256x128xf32, #tpu.memory_space<vmem>>, vector<256x128xf32>
      %c0_19 = arith.constant 0 : index
      %c0_20 = arith.constant 0 : index
      %24 = vector.load %arg6[%c0_19, %c0_20] : memref<256x128xf32, #tpu.memory_space<vmem>>, vector<256x128xf32>
      tpu.vector_store %arg6[%c0_19, %c0_20], %23 {strides = array<i32>} : memref<256x128xf32, #tpu.memory_space<vmem>>, vector<256x128xf32>,
    } else {
    }
    return
  }
  func.func @transform_0(%arg0: i32, %arg1: i32) -> (i32, i32) {
    %c0_i32 = arith.constant 0 : i32
    %c0_i32_0 = arith.constant 0 : i32
    return %arg0, %c0_i32 : i32, i32
  }
  func.func @transform_1(%arg0: i32, %arg1: i32) -> (i32, i32) {
    %c0_i32 = arith.constant 0 : i32
    %c0_i32_0 = arith.constant 0 : i32
    return %c0_i32, %arg1 : i32, i32
  }
  func.func @transform_2(%arg0: i32, %arg1: i32) -> (i32, i32) {
    %c0_i32 = arith.constant 0 : i32
    %c0_i32_0 = arith.constant 0 : i32
    return %c0_i32, %arg1 : i32, i32
  }
  func.func @transform_3(%arg0: i32, %arg1: i32) -> (i32, i32) {
    %c0_i32 = arith.constant 0 : i32
    %c0_i32_0 = arith.constant 0 : i32
    return %arg1, %c0_i32 : i32, i32
  }
  func.func @transform_4(%arg0: i32, %arg1: i32) -> (i32, i32) {
    %c0_i32 = arith.constant 0 : i32
    %c0_i32_0 = arith.constant 0 : i32
    return %arg0, %c0_i32 : i32, i32
  }
}

</mosaic_0001>

<bundles_post_ra>
// kernel: tpu_custom_call.1
= control target key start
LH: loop header
LB: loop body
LE: loop exit
PB: predicated region body
PF: predicated region fallthrough
CT: control target
= control target key end

     0   :  { %9 = vsyncpa [#allocation4], 0  ;;  %s4623_s0 = inlined_call_operand.hbm [shape: f32[256,128], index: 0, kind: input, shape index: {}]   ;;  %s4624_s1 = inlined_call_operand.hbm [shape: f32[128,384], index: 1, kind: input, shape index: {}]   ;;  %s4625_s2 = inlined_call_operand.hbm [shape: f32[128,384], index: 2, kind: input, shape index: {}]   ;;  %s4626_s3 = inlined_call_operand.hbm [shape: f32[384,128], index: 3, kind: input, shape index: {}]   ;;  %s4627_s4 = inlined_call_operand.hbm [shape: f32[256,128], index: 4, kind: output, shape index: {}]  }
   0x1   :  { %10 = vsyncpa [#allocation7], 0 }
   0x2   :  { %11 = vsyncpa [#allocation10], 0 }
   0x3   :  { %12 = vsyncpa [#allocation5], 0  ;;  %s3663_s15 = smov [#allocation6]  }
   0x4   :  { %s30_s16 = sshll.u32 %s3663_s15, 4  ;;  %s31_s16 = int_to_ptr.vmem [resolvable:$true] %s30_s16 }
   0x5   :  { %s3563_s17 = scalar_lea.vmem %s31_s16, 6144  ;;  %p3568_p1 = scmp.lt.s32.totalorder %s31_s16, %s31_s16 }
   0x6   :  { %p3564_p0 = scmp.ne.s32.totalorder %s31_s16, %s3563_s17  ;;  %p3569_p2 = scmp.lt.s32.totalorder %s3563_s17, %s3563_s17 }
   0x8   :  { %p3570_p3 = por %p3569_p2, %p3568_p1 }
   0xa   :  { %p3571_p4 = pnand %p3570_p3, %p3564_p0 }
   0xc   :  { %3574 = shalt.err (!%p3571_p4)
}
   0xd   :  { %s3664_s18 = smov 384   ;;  %s3665_s19 = smov 24  }
   0xe   :  { %36 = dma.hbm_to_vmem [thread:$0]  %s4624_s1, 6144, %s31_s16, [#allocation7], %s3664_s18, %s3664_s18, %s3665_s19  }
   0xf   :  { %s3666_s22 = smov [#allocation3]  }
  0x10   :  { %s18_s23 = sshll.u32 %s3666_s22, 4  ;;  %s19_s23 = int_to_ptr.vmem [resolvable:$true] %s18_s23 }
  0x11   :  { %s3583_s24 = scalar_lea.vmem %s19_s23, 4096  ;;  %p3588_p6 = scmp.lt.s32.totalorder %s19_s23, %s19_s23 }
  0x12   :  { %p3584_p5 = scmp.ne.s32.totalorder %s19_s23, %s3583_s24  ;;  %p3589_p7 = scmp.lt.s32.totalorder %s3583_s24, %s3583_s24 }
  0x14   :  { %p3590_p8 = por %p3589_p7, %p3588_p6 }
  0x16   :  { %p3591_p9 = pnand %p3590_p8, %p3584_p5 }
  0x18   :  { %3594 = shalt.err (!%p3591_p9)
}
  0x19   :  { %s3667_s25 = smov 128   ;;  %s3668_s26 = smov 8  }
  0x1a   :  { %24 = dma.hbm_to_vmem [thread:$0]  %s4623_s0, 4096, %s19_s23, [#allocation4], %s3667_s25, %s3667_s25, %s3668_s26  }
  0x1b   :  { %s3669_s1 = smov [#allocation8]   ;;  %s3670_s30 = smov [#allocation9]  }
  0x1c   :  { %s42_s29 = sshll.u32 %s3669_s1, 4  ;;  %s54_s5 = sshll.u32 %s3670_s30, 4  ;;  %s43_s29 = int_to_ptr.vmem [resolvable:$true] %s42_s29  ;;  %s55_s5 = int_to_ptr.vmem [resolvable:$true] %s54_s5 }
  0x1d   :  { %s3603_s6 = scalar_lea.vmem %s43_s29, 6144  ;;  %p3608_p11 = scmp.lt.s32.totalorder %s43_s29, %s43_s29 }
  0x1e   :  { %p3604_p10 = scmp.ne.s32.totalorder %s43_s29, %s3603_s6  ;;  %p3609_p12 = scmp.lt.s32.totalorder %s3603_s6, %s3603_s6 }
  0x20   :  { %p3610_p13 = por %p3609_p12, %p3608_p11 }
  0x22   :  { %p3611_p0 = pnand %p3610_p13, %p3604_p10 }
  0x24   :  { %3614 = shalt.err (!%p3611_p0)
}
  0x25   :  { %48 = dma.hbm_to_vmem [thread:$0]  %s4625_s2, 6144, %s43_s29, [#allocation7], %s3664_s18, %s3664_s18, %s3665_s19  }
  0x26   :  { %s3623_s0 = scalar_lea.vmem %s55_s5, 6144  ;;  %p3628_p2 = scmp.lt.s32.totalorder %s55_s5, %s55_s5 }
  0x27   :  { %p3624_p1 = scmp.ne.s32.totalorder %s55_s5, %s3623_s0  ;;  %p3629_p3 = scmp.lt.s32.totalorder %s3623_s0, %s3623_s0 }
  0x29   :  { %p3630_p4 = por %p3629_p3, %p3628_p2 }
  0x2b   :  { %p3631_p5 = pnand %p3630_p4, %p3624_p1 }
  0x2d   :  { %3634 = shalt.err (!%p3631_p5)
}
  0x2e   :  { %60 = dma.hbm_to_vmem [thread:$0]  %s4626_s3, 6144, %s55_s5, [#allocation10], %s3667_s25, %s3667_s25, %s3668_s26  }
  0x2f   :  { %3655 = dma.done.wait [#allocation4], 4096  }
  0x30   :  { %3656 = vsyncadd [#allocation4], 4294963200 }
  0x31   :  { %3657 = dma.done.wait [#allocation7], 12288  }
  0x32   :  { %3658 = vsyncadd [#allocation7], 4294955008 }
  0x33   :  { %3659 = dma.done.wait [#allocation10], 6144  }
  0x34   :  { %3660 = vsyncadd [#allocation10], 4294961152  ;;  %v3671_v0 = vmov 0.0   ;;  %v187_v1 = vld [vmem:[#allocation6 + $0x170] sm:$0xff]  ;;  %v186_v2 = vld [vmem:[#allocation6 + $0x168] sm:$0xff]  ;;  %s3672_s2 = smov [#allocation11]  }
  0x35   :  { %253 = vmatprep.mubr.f32.mxu0 %v3671_v0  ;;  %397 = vmatprep.mubr.f32.mxu1 %v3671_v0  ;;  %v184_v3 = vld [vmem:[#allocation6 + $0x158] sm:$0xff]  ;;  %v183_v4 = vld [vmem:[#allocation6 + $0x150] sm:$0xff]  ;;  %v181_v5 = vld [vmem:[#allocation6 + $0x140] sm:$0xff]  ;;  %s2635_s3 = sshll.u32 %s3672_s2, 4  ;;  %s2636_s3 = int_to_ptr.vmem [resolvable:$true] %s2635_s3 }
  0x36   :  { %189 = vmatprep.subr.mxu0 %v187_v1  ;;  %3129 = vmatprep.subr.mxu1 %v187_v1  ;;  %v180_v6 = vld [vmem:[#allocation6 + $0x138] sm:$0xff]  ;;  %v178_v7 = vld [vmem:[#allocation6 + $0x128] sm:$0xff]  ;;  %v177_v8 = vld [vmem:[#allocation6 + $0x120] sm:$0xff]  ;;  %s3635_s11 = scalar_lea.vmem %s2636_s3, 4096  ;;  %p3640_p7 = scmp.lt.s32.totalorder %s2636_s3, %s2636_s3 }
  0x37   :  { %190 = vmatpush1.msra.mxu0 %v186_v2  ;;  %3145 = vmatpush1.msra.mxu1 %v186_v2  ;;  %v175_v9 = vld [vmem:[#allocation6 + $0x110] sm:$0xff]  ;;  %v174_v10 = vld [vmem:[#allocation6 + $0x108] sm:$0xff]  ;;  %v172_v11 = vld [vmem:[#allocation6 + $0xf8] sm:$0xff]  ;;  %p3636_p6 = scmp.ne.s32.totalorder %s2636_s3, %s3635_s11  ;;  %p3641_p8 = scmp.lt.s32.totalorder %s3635_s11, %s3635_s11 }
  0x38   :  { %191 = vmatprep.subr.mxu0 %v184_v3  ;;  %3130 = vmatprep.subr.mxu1 %v184_v3  ;;  %v171_v12 = vld [vmem:[#allocation6 + $0xf0] sm:$0xff]  ;;  %v169_v13 = vld [vmem:[#allocation6 + $0xe0] sm:$0xff]  ;;  %v168_v14 = vld [vmem:[#allocation6 + $0xd8] sm:$0xff] }
  0x39   :  { %192 = vmatpush1.msra.mxu0 %v183_v4  ;;  %3146 = vmatpush1.msra.mxu1 %v183_v4  ;;  %v166_v15 = vld [vmem:[#allocation6 + $0xc8] sm:$0xff]  ;;  %v165_v16 = vld [vmem:[#allocation6 + $0xc0] sm:$0xff]  ;;  %v163_v17 = vld [vmem:[#allocation6 + $0xb0] sm:$0xff]  ;;  %p3642_p9 = por %p3641_p8, %p3640_p7 }
  0x3a   :  { %193 = vmatprep.subr.mxu0 %v181_v5  ;;  %3131 = vmatprep.subr.mxu1 %v181_v5  ;;  %v162_v18 = vld [vmem:[#allocation6 + $0xa8] sm:$0xff]  ;;  %v160_v19 = vld [vmem:[#allocation6 + $0x98] sm:$0xff]  ;;  %v159_v20 = vld [vmem:[#allocation6 + $0x90] sm:$0xff] }
  0x3b   :  { %194 = vmatpush1.msra.mxu0 %v180_v6  ;;  %3147 = vmatpush1.msra.mxu1 %v180_v6  ;;  %v157_v21 = vld [vmem:[#allocation6 + $0x80] sm:$0xff]  ;;  %v156_v22 = vld [vmem:[#allocation6 + $0x78] sm:$0xff]  ;;  %v154_v23 = vld [vmem:[#allocation6 + $0x68] sm:$0xff]  ;;  %p3643_p10 = pnand %p3642_p9, %p3636_p6 }
  0x3c   :  { %195 = vmatprep.subr.mxu0 %v178_v7  ;;  %3132 = vmatprep.subr.mxu1 %v178_v7  ;;  %v153_v24 = vld [vmem:[#allocation6 + $0x60] sm:$0xff]  ;;  %v151_v25 = vld [vmem:[#allocation6 + $0x50] sm:$0xff]  ;;  %v150_v26 = vld [vmem:[#allocation6 + $0x48] sm:$0xff] }
  0x3d   :  { %196 = vmatpush1.msra.mxu0 %v177_v8  ;;  %3148 = vmatpush1.msra.mxu1 %v177_v8  ;;  %v148_v27 = vld [vmem:[#allocation6 + $0x38] sm:$0xff]  ;;  %v147_v28 = vld [vmem:[#allocation6 + $0x30] sm:$0xff]  ;;  %v145_v29 = vld [vmem:[#allocation6 + $0x20] sm:$0xff] }
  0x3e   :  { %197 = vmatprep.subr.mxu0 %v175_v9  ;;  %3133 = vmatprep.subr.mxu1 %v175_v9  ;;  %v144_v30 = vld [vmem:[#allocation6 + $0x18] sm:$0xff]  ;;  %v142_v31 = vld [vmem:[#allocation6 + $0x8] sm:$0xff]  ;;  %v141_v32 = vld [vmem:[#allocation6] sm:$0xff] }
  0x3f   :  { %198 = vmatpush1.msra.mxu0 %v174_v10  ;;  %3149 = vmatpush1.msra.mxu1 %v174_v10  ;;  %v3724_v33 = vld [vmem:[#allocation3] sm:$0xff]  ;;  %v188_v35 = vld [vmem:[#allocation6 + $0x178] sm:$0xff]  ;;  %v3733_v38 = vld [vmem:[#allocation3 + $0x8] sm:$0xff] }
  0x40   :  { %199 = vmatprep.subr.mxu0 %v172_v11  ;;  %3134 = vmatprep.subr.mxu1 %v172_v11  ;;  %v3726_v34 = vld [vmem:[#allocation3 + $0xc0] sm:$0xff]  ;;  %v3730_v37 = vld [vmem:[#allocation8 + $0x178] sm:$0xff]  ;;  %v3736_v39 = vld [vmem:[#allocation3 + $0xc8] sm:$0xff] }
  0x41   :  { %200 = vmatpush1.msra.mxu0 %v171_v12  ;;  %3150 = vmatpush1.msra.mxu1 %v171_v12  ;;  %v185_v36 = vld [vmem:[#allocation6 + $0x160] sm:$0xff]  ;;  %v182_v40 = vld [vmem:[#allocation6 + $0x148] sm:$0xff]  ;;  %v179_v41 = vld [vmem:[#allocation6 + $0x130] sm:$0xff] }
  0x42   :  { %201 = vmatprep.subr.mxu0 %v169_v13  ;;  %3135 = vmatprep.subr.mxu1 %v169_v13  ;;  %v3741_v42 = vld [vmem:[#allocation3 + $0x10] sm:$0xff]  ;;  %v176_v44 = vld [vmem:[#allocation6 + $0x118] sm:$0xff]  ;;  %v173_v45 = vld [vmem:[#allocation6 + $0x100] sm:$0xff] }
  0x43   :  { %202 = vmatpush1.msra.mxu0 %v168_v14  ;;  %3151 = vmatpush1.msra.mxu1 %v168_v14  ;;  %v3744_v43 = vld [vmem:[#allocation3 + $0xd0] sm:$0xff]  ;;  %v3749_v46 = vld [vmem:[#allocation3 + $0x18] sm:$0xff]  ;;  %v170_v48 = vld [vmem:[#allocation6 + $0xe8] sm:$0xff] }
  0x44   :  { %203 = vmatprep.subr.mxu0 %v166_v15  ;;  %3136 = vmatprep.subr.mxu1 %v166_v15  ;;  %v3752_v47 = vld [vmem:[#allocation3 + $0xd8] sm:$0xff]  ;;  %v167_v49 = vld [vmem:[#allocation6 + $0xd0] sm:$0xff]  ;;  %v3757_v50 = vld [vmem:[#allocation3 + $0x20] sm:$0xff] }
  0x45   :  { %204 = vmatpush1.msra.mxu0 %v165_v16  ;;  %3152 = vmatpush1.msra.mxu1 %v165_v16  ;;  %v3760_v51 = vld [vmem:[#allocation3 + $0xe0] sm:$0xff]  ;;  %v164_v52 = vld [vmem:[#allocation6 + $0xb8] sm:$0xff]  ;;  %v3765_v54 = vld [vmem:[#allocation3 + $0x28] sm:$0xff] }
  0x46   :  { %205 = vmatprep.subr.mxu0 %v163_v17  ;;  %3137 = vmatprep.subr.mxu1 %v163_v17  ;;  %v161_v53 = vld [vmem:[#allocation6 + $0xa0] sm:$0xff]  ;;  %v3768_v55 = vld [vmem:[#allocation3 + $0xe8] sm:$0xff]  ;;  %v155_v57 = vld [vmem:[#allocation6 + $0x70] sm:$0xff] }
  0x47   :  { %206 = vmatpush1.msra.mxu0 %v162_v18  ;;  %3153 = vmatpush1.msra.mxu1 %v162_v18  ;;  %v158_v56 = vld [vmem:[#allocation6 + $0x88] sm:$0xff]  ;;  %v3773_v58 = vld [vmem:[#allocation3 + $0x30] sm:$0xff]  ;;  %v152_v60 = vld [vmem:[#allocation6 + $0x58] sm:$0xff] }
  0x48   :  { %207 = vmatprep.subr.mxu0 %v160_v19  ;;  %3138 = vmatprep.subr.mxu1 %v160_v19  ;;  %v3776_v59 = vld [vmem:[#allocation3 + $0xf0] sm:$0xff]  ;;  %v149_v61 = vld [vmem:[#allocation6 + $0x40] sm:$0xff]  ;;  %v3781_v62 = vld [vmem:[#allocation3 + $0x38] sm:$0xff] }
  0x49   :  { %208 = vmatpush1.msra.mxu0 %v159_v20  ;;  %3154 = vmatpush1.msra.mxu1 %v159_v20  ;;  %v3784_v63 = vld [vmem:[#allocation3 + $0xf8] sm:$0xff]  ;;  %v146_v1 = vld [vmem:[#allocation6 + $0x28] sm:$0xff]  ;;  %v143_v2 = vld [vmem:[#allocation6 + $0x10] sm:$0xff] }
  0x4a   :  { %209 = vmatprep.subr.mxu0 %v157_v21  ;;  %3139 = vmatprep.subr.mxu1 %v157_v21  ;;  %v3789_v3 = vld [vmem:[#allocation3 + $0x40] sm:$0xff]  ;;  %v717_v4 = vld [vmem:[#allocation8 + $0x170] sm:$0xff]  ;;  %v716_v5 = vld [vmem:[#allocation8 + $0x168] sm:$0xff] }
  0x4b   :  { %210 = vmatpush1.msra.mxu0 %v156_v22  ;;  %3155 = vmatpush1.msra.mxu1 %v156_v22  ;;  %v714_v6 = vld [vmem:[#allocation8 + $0x158] sm:$0xff]  ;;  %v3795_v7 = vld [vmem:[#allocation3 + $0x48] sm:$0xff]  ;;  %v713_v8 = vld [vmem:[#allocation8 + $0x150] sm:$0xff] }
  0x4c   :  { %211 = vmatprep.subr.mxu0 %v154_v23  ;;  %3140 = vmatprep.subr.mxu1 %v154_v23  ;;  %v711_v9 = vld [vmem:[#allocation8 + $0x140] sm:$0xff]  ;;  %v710_v10 = vld [vmem:[#allocation8 + $0x138] sm:$0xff]  ;;  %v3802_v11 = vld [vmem:[#allocation3 + $0x50] sm:$0xff] }
  0x4d   :  { %212 = vmatpush1.msra.mxu0 %v153_v24  ;;  %3156 = vmatpush1.msra.mxu1 %v153_v24  ;;  %v708_v12 = vld [vmem:[#allocation8 + $0x128] sm:$0xff]  ;;  %v707_v13 = vld [vmem:[#allocation8 + $0x120] sm:$0xff]  ;;  %v705_v14 = vld [vmem:[#allocation8 + $0x110] sm:$0xff] }
  0x4e   :  { %213 = vmatprep.subr.mxu0 %v151_v25  ;;  %3141 = vmatprep.subr.mxu1 %v151_v25  ;;  %v715_v15 = vld [vmem:[#allocation8 + $0x160] sm:$0xff]  ;;  %v3809_v16 = vld [vmem:[#allocation3 + $0x58] sm:$0xff]  ;;  %v704_v17 = vld [vmem:[#allocation8 + $0x108] sm:$0xff] }
  0x4f   :  { %214 = vmatpush1.msra.mxu0 %v150_v26  ;;  %3157 = vmatpush1.msra.mxu1 %v150_v26  ;;  %v702_v18 = vld [vmem:[#allocation8 + $0xf8] sm:$0xff]  ;;  %v701_v19 = vld [vmem:[#allocation8 + $0xf0] sm:$0xff]  ;;  %v3815_v20 = vld [vmem:[#allocation3 + $0x60] sm:$0xff] }
  0x50   :  { %215 = vmatprep.subr.mxu0 %v148_v27  ;;  %3142 = vmatprep.subr.mxu1 %v148_v27  ;;  %v699_v21 = vld [vmem:[#allocation8 + $0xe0] sm:$0xff]  ;;  %v698_v22 = vld [vmem:[#allocation8 + $0xd8] sm:$0xff]  ;;  %v696_v23 = vld [vmem:[#allocation8 + $0xc8] sm:$0xff] }
  0x51   :  { %216 = vmatpush1.msra.mxu0 %v147_v28  ;;  %3158 = vmatpush1.msra.mxu1 %v147_v28  ;;  %v712_v24 = vld [vmem:[#allocation8 + $0x148] sm:$0xff]  ;;  %v695_v26 = vld [vmem:[#allocation8 + $0xc0] sm:$0xff]  ;;  %v693_v27 = vld [vmem:[#allocation8 + $0xb0] sm:$0xff] }
  0x52   :  { %217 = vmatprep.subr.mxu0 %v145_v29  ;;  %3143 = vmatprep.subr.mxu1 %v145_v29  ;;  %v3821_v25 = vld [vmem:[#allocation3 + $0x68] sm:$0xff]  ;;  %v3827_v29 = vld [vmem:[#allocation3 + $0x70] sm:$0xff] }
  0x53   :  { %218 = vmatpush1.msra.mxu0 %v144_v30  ;;  %3159 = vmatpush1.msra.mxu1 %v144_v30  ;;  %v692_v28 = vld [vmem:[#allocation8 + $0xa8] sm:$0xff]  ;;  %v690_v30 = vld [vmem:[#allocation8 + $0x98] sm:$0xff] }
  0x54   :  { %219 = vmatprep.subr.mxu0 %v142_v31  ;;  %3144 = vmatprep.subr.mxu1 %v142_v31  ;;  %v689_v31 = vld [vmem:[#allocation8 + $0x90] sm:$0xff] }
  0x55   :  { %220 = vmatpush1.msra.mxu0 %v141_v32  ;;  %3160 = vmatpush1.msra.mxu1 %v141_v32  ;;  %v709_v32 = vld [vmem:[#allocation8 + $0x130] sm:$0xff] }
  0x56   :  { %254 = vmatmul.mubr.f32.vlgmr.msra.gmra.mxu0 %v3724_v33  ;;  %398 = vmatmul.mubr.f32.vlgmr.msra.gmra.mxu1 %v3726_v34 }
  0x57   :  { %2889 = vmatprep.subr.mxu1 %v188_v35  ;;  %259 = vmatprep.mubr.f32.mxu0 %v3671_v0 }
  0x58   :  { %2890 = vmatpush3.msra.mxu1 %v188_v35  ;;  %403 = vmatprep.mubr.f32.mxu1 %v3671_v0  ;;  %v687_v35 = vld [vmem:[#allocation8 + $0x80] sm:$0xff] }
  0x59   :  { %2891 = vmatprep.subr.mxu1 %v185_v36  ;;  %2969 = vmatprep.subr.mxu0 %v3730_v37 }
  0x5a   :  { %2892 = vmatpush3.msra.mxu1 %v185_v36  ;;  %260 = vmatmul.mubr.f32.gmra.mxu0 %v3733_v38  ;;  %v3833_v36 = vld [vmem:[#allocation3 + $0x78] sm:$0xff] }
  0x5b   :  { %404 = vmatmul.mubr.f32.gmra.mxu1 %v3736_v39  ;;  %2893 = vmatprep.subr.mxu1 %v182_v40 }
  0x5c   :  { %2894 = vmatpush3.msra.mxu1 %v182_v40  ;;  %265 = vmatprep.mubr.f32.mxu0 %v3671_v0  ;;  %v3836_v40 = vld [vmem:[#allocation3 + $0x80] sm:$0xff] }
  0x5d   :  { %2895 = vmatprep.subr.mxu1 %v179_v41  ;;  %409 = vmatprep.mubr.f32.mxu1 %v3671_v0 }
  0x5e   :  { %2896 = vmatpush3.msra.mxu1 %v179_v41  ;;  %266 = vmatmul.mubr.f32.gmra.mxu0 %v3741_v42  ;;  %v706_v41 = vld [vmem:[#allocation8 + $0x118] sm:$0xff] }
  0x5f   :  { %410 = vmatmul.mubr.f32.gmra.mxu1 %v3744_v43  ;;  %2897 = vmatprep.subr.mxu1 %v176_v44 }
  0x60   :  { %2898 = vmatpush3.msra.mxu1 %v176_v44  ;;  %271 = vmatprep.mubr.f32.mxu0 %v3671_v0  ;;  %v684_v44 = vld [vmem:[#allocation8 + $0x68] sm:$0xff] }
  0x61   :  { %2899 = vmatprep.subr.mxu1 %v173_v45  ;;  %415 = vmatprep.mubr.f32.mxu1 %v3671_v0 }
  0x62   :  { %2900 = vmatpush3.msra.mxu1 %v173_v45  ;;  %272 = vmatmul.mubr.f32.gmra.mxu0 %v3749_v46  ;;  %v683_v45 = vld [vmem:[#allocation8 + $0x60] sm:$0xff] }
  0x63   :  { %416 = vmatmul.mubr.f32.gmra.mxu1 %v3752_v47  ;;  %2901 = vmatprep.subr.mxu1 %v170_v48 }
  0x64   :  { %2902 = vmatpush3.msra.mxu1 %v170_v48  ;;  %277 = vmatprep.mubr.f32.mxu0 %v3671_v0  ;;  %v3842_v48 = vld [vmem:[#allocation3 + $0x88] sm:$0xff] }
  0x65   :  { %2903 = vmatprep.subr.mxu1 %v167_v49  ;;  %421 = vmatprep.mubr.f32.mxu1 %v3671_v0 }
  0x66   :  { %2904 = vmatpush3.msra.mxu1 %v167_v49  ;;  %278 = vmatmul.mubr.f32.gmra.mxu0 %v3757_v50  ;;  %v3844_v49 = vld [vmem:[#allocation3 + $0x90] sm:$0xff] }
  0x67   :  { %422 = vmatmul.mubr.f32.gmra.mxu1 %v3760_v51  ;;  %2905 = vmatprep.subr.mxu1 %v164_v52 }
  0x68   :  { %2906 = vmatpush3.msra.mxu1 %v164_v52  ;;  %283 = vmatprep.mubr.f32.mxu0 %v3671_v0  ;;  %v703_v52 = vld [vmem:[#allocation8 + $0x100] sm:$0xff] }
  0x69   :  { %2907 = vmatprep.subr.mxu1 %v161_v53  ;;  %427 = vmatprep.mubr.f32.mxu1 %v3671_v0 }
  0x6a   :  { %2908 = vmatpush3.msra.mxu1 %v161_v53  ;;  %284 = vmatmul.mubr.f32.gmra.mxu0 %v3765_v54  ;;  %v681_v53 = vld [vmem:[#allocation8 + $0x50] sm:$0xff] }
  0x6b   :  { %428 = vmatmul.mubr.f32.gmra.mxu1 %v3768_v55  ;;  %2909 = vmatprep.subr.mxu1 %v158_v56 }
  0x6c   :  { %2910 = vmatpush3.msra.mxu1 %v158_v56  ;;  %289 = vmatprep.mubr.f32.mxu0 %v3671_v0  ;;  %v680_v56 = vld [vmem:[#allocation8 + $0x48] sm:$0xff] }
  0x6d   :  { %2911 = vmatprep.subr.mxu1 %v155_v57  ;;  %433 = vmatprep.mubr.f32.mxu1 %v3671_v0 }
  0x6e   :  { %2912 = vmatpush3.msra.mxu1 %v155_v57  ;;  %290 = vmatmul.mubr.f32.gmra.mxu0 %v3773_v58  ;;  %v3850_v57 = vld [vmem:[#allocation3 + $0x98] sm:$0xff] }
  0x6f   :  { %434 = vmatmul.mubr.f32.gmra.mxu1 %v3776_v59  ;;  %2913 = vmatprep.subr.mxu1 %v152_v60 }
  0x70   :  { %2914 = vmatpush3.msra.mxu1 %v152_v60  ;;  %295 = vmatprep.mubr.f32.mxu0 %v3671_v0  ;;  %v3852_v60 = vld [vmem:[#allocation3 + $0xa0] sm:$0xff] }
  0x71   :  { %2915 = vmatprep.subr.mxu1 %v149_v61  ;;  %439 = vmatprep.mubr.f32.mxu1 %v3671_v0 }
  0x72   :  { %2916 = vmatpush3.msra.mxu1 %v149_v61  ;;  %296 = vmatmul.mubr.f32.gmra.mxu0 %v3781_v62  ;;  %v700_v61 = vld [vmem:[#allocation8 + $0xe8] sm:$0xff] }
  0x73   :  { %440 = vmatmul.mubr.f32.gmra.mxu1 %v3784_v63  ;;  %2917 = vmatprep.subr.mxu1 %v146_v1 }
  0x74   :  { %2918 = vmatpush3.msra.mxu1 %v146_v1  ;;  %301 = vmatprep.mubr.f32.mxu0 %v3671_v0  ;;  %v678_v1 = vld [vmem:[#allocation8 + $0x38] sm:$0xff] }
  0x75   :  { %2919 = vmatprep.subr.mxu1 %v143_v2  ;;  %2921 = vmatprep.mubr.f32.mxu1 %v3724_v33 }
  0x76   :  { %2920 = vmatpush3.msra.mxu1 %v143_v2  ;;  %302 = vmatmul.mubr.f32.gmra.mxu0 %v3789_v3  ;;  %v677_v2 = vld [vmem:[#allocation8 + $0x30] sm:$0xff] }
  0x77   :  { %2922 = vmatmul.mubr.f32.vlgmr.msra.gmra.mxu1 %v3733_v38  ;;  %719 = vmatprep.subr.mxu1 %v717_v4  ;;  %v3858_v4 = vld [vmem:[#allocation3 + $0xa8] sm:$0xff] }
  0x78   :  { %720 = vmatpush1.msra.mxu1 %v716_v5  ;;  %307 = vmatprep.mubr.f32.mxu0 %v3671_v0  ;;  %v3860_v5 = vld [vmem:[#allocation3 + $0xb0] sm:$0xff] }
  0x79   :  { %2924 = vmatprep.mubr.f32.mxu1 %v3741_v42  ;;  %721 = vmatprep.subr.mxu1 %v714_v6  ;;  %v697_v6 = vld [vmem:[#allocation8 + $0xd0] sm:$0xff] }
  0x7a   :  { %308 = vmatmul.mubr.f32.gmra.mxu0 %v3795_v7  ;;  %722 = vmatpush1.msra.mxu1 %v713_v8  ;;  %v675_v8 = vld [vmem:[#allocation8 + $0x20] sm:$0xff] }
  0x7b   :  { %2925 = vmatmul.mubr.f32.gmra.mxu1 %v3749_v46  ;;  %313 = vmatprep.mubr.f32.mxu0 %v3671_v0 }
  0x7c   :  { %2927 = vmatprep.mubr.f32.mxu1 %v3757_v50  ;;  %723 = vmatprep.subr.mxu1 %v711_v9  ;;  %v674_v9 = vld [vmem:[#allocation8 + $0x18] sm:$0xff] }
  0x7d   :  { %724 = vmatpush1.msra.mxu1 %v710_v10  ;;  %2970 = vmatpush3.msra.mxu0 %v3730_v37  ;;  %v686_v37 = vld [vmem:[#allocation8 + $0x78] sm:$0xff] }
  0x7e   :  { %314 = vmatmul.mubr.f32.gmra.mxu0 %v3802_v11  ;;  %725 = vmatprep.subr.mxu1 %v708_v12  ;;  %v3866_v10 = vld [vmem:[#allocation3 + $0xb8] sm:$0xff] }
  0x7f   :  { %2928 = vmatmul.mubr.f32.gmra.mxu1 %v3765_v54  ;;  %319 = vmatprep.mubr.f32.mxu0 %v3671_v0  ;;  %v694_v12 = vld [vmem:[#allocation8 + $0xb8] sm:$0xff] }
  0x80   :  { %2930 = vmatprep.mubr.f32.mxu1 %v3773_v58  ;;  %726 = vmatpush1.msra.mxu1 %v707_v13  ;;  %v672_v13 = vld [vmem:[#allocation8 + $0x8] sm:$0xff] }
  0x81   :  { %727 = vmatprep.subr.mxu1 %v705_v14  ;;  %2971 = vmatprep.subr.mxu0 %v715_v15  ;;  %v671_v14 = vld [vmem:[#allocation8] sm:$0xff] }
  0x82   :  { %320 = vmatmul.mubr.f32.gmra.mxu0 %v3809_v16  ;;  %728 = vmatpush1.msra.mxu1 %v704_v17  ;;  %v688_v17 = vld [vmem:[#allocation8 + $0x88] sm:$0xff] }
  0x83   :  { %2931 = vmatmul.mubr.f32.gmra.mxu1 %v3781_v62  ;;  %325 = vmatprep.mubr.f32.mxu0 %v3671_v0 }
  0x84   :  { %2933 = vmatprep.mubr.f32.mxu1 %v3789_v3  ;;  %729 = vmatprep.subr.mxu1 %v702_v18  ;;  %v685_v18 = vld [vmem:[#allocation8 + $0x70] sm:$0xff] }
  0x85   :  { %730 = vmatpush1.msra.mxu1 %v701_v19  ;;  %2972 = vmatpush3.msra.mxu0 %v715_v15  ;;  %v691_v15 = vld [vmem:[#allocation8 + $0xa0] sm:$0xff]  ;;  %v682_v19 = vld [vmem:[#allocation8 + $0x58] sm:$0xff] }
  0x86   :  { %326 = vmatmul.mubr.f32.gmra.mxu0 %v3815_v20  ;;  %731 = vmatprep.subr.mxu1 %v699_v21  ;;  %v679_v21 = vld [vmem:[#allocation8 + $0x40] sm:$0xff] }
  0x87   :  { %2934 = vmatmul.mubr.f32.gmra.mxu1 %v3795_v7  ;;  %331 = vmatprep.mubr.f32.mxu0 %v3671_v0 }
  0x88   :  { %2936 = vmatprep.mubr.f32.mxu1 %v3802_v11  ;;  %732 = vmatpush1.msra.mxu1 %v698_v22  ;;  %v676_v22 = vld [vmem:[#allocation8 + $0x28] sm:$0xff] }
  0x89   :  { %733 = vmatprep.subr.mxu1 %v696_v23  ;;  %2973 = vmatprep.subr.mxu0 %v712_v24  ;;  %v673_v23 = vld [vmem:[#allocation8 + $0x10] sm:$0xff] }
  0x8a   :  { %332 = vmatmul.mubr.f32.gmra.mxu0 %v3821_v25  ;;  %734 = vmatpush1.msra.mxu1 %v695_v26  ;;  %v2046_v26 = vld [vmem:[#allocation9 + $0x168] sm:$0xff] }
  0x8b   :  { %2937 = vmatmul.mubr.f32.gmra.mxu1 %v3809_v16  ;;  %337 = vmatprep.mubr.f32.mxu0 %v3671_v0 }
  0x8c   :  { %2939 = vmatprep.mubr.f32.mxu1 %v3815_v20  ;;  %735 = vmatprep.subr.mxu1 %v693_v27  ;;  %v2045_v27 = vld [vmem:[#allocation9 + $0x160] sm:$0xff] }
  0x8d   :  { %736 = vmatpush1.msra.mxu1 %v692_v28  ;;  %2974 = vmatpush3.msra.mxu0 %v712_v24  ;;  %v2005_v24 = vld [vmem:[#allocation9 + $0x20] sm:$0xff] }
  0x8e   :  { %338 = vmatmul.mubr.f32.gmra.mxu0 %v3827_v29  ;;  %737 = vmatprep.subr.mxu1 %v690_v30  ;;  %v2003_v30 = vld [vmem:[#allocation9 + $0x10] sm:$0xff] }
  0x8f   :  { %2940 = vmatmul.mubr.f32.gmra.mxu1 %v3821_v25  ;;  %343 = vmatprep.mubr.f32.mxu0 %v3671_v0 }
  0x90   :  { %2942 = vmatprep.mubr.f32.mxu1 %v3827_v29  ;;  %738 = vmatpush1.msra.mxu1 %v689_v31 }
  0x91   :  { %2975 = vmatprep.subr.mxu0 %v709_v32  ;;  %739 = vmatprep.subr.mxu1 %v687_v35  ;;  %v2002_v35 = vld [vmem:[#allocation9 + $0x8] sm:$0xff] }
  0x92   :  { %344 = vmatmul.mubr.f32.gmra.mxu0 %v3833_v36  ;;  %740 = vmatpush1.msra.mxu1 %v686_v37 }
  0x93   :  { %2943 = vmatmul.mubr.f32.gmra.mxu1 %v3833_v36  ;;  %349 = vmatprep.mubr.f32.mxu0 %v3671_v0 }
  0x94   :  { %2945 = vmatprep.mubr.f32.mxu1 %v3836_v40  ;;  %2976 = vmatpush3.msra.mxu0 %v709_v32 }
  0x95   :  { %2977 = vmatprep.subr.mxu0 %v706_v41  ;;  %741 = vmatprep.subr.mxu1 %v684_v44  ;;  %v2032_v44 = vld [vmem:[#allocation9 + $0xf8] sm:$0xff] }
  0x96   :  { %350 = vmatmul.mubr.f32.gmra.mxu0 %v3836_v40  ;;  %742 = vmatpush1.msra.mxu1 %v683_v45 }
  0x97   :  { %2946 = vmatmul.mubr.f32.gmra.mxu1 %v3842_v48  ;;  %355 = vmatprep.mubr.f32.mxu0 %v3671_v0 }
  0x98   :  { %2948 = vmatprep.mubr.f32.mxu1 %v3844_v49  ;;  %2978 = vmatpush3.msra.mxu0 %v706_v41 }
  0x99   :  { %2979 = vmatprep.subr.mxu0 %v703_v52  ;;  %743 = vmatprep.subr.mxu1 %v681_v53  ;;  %v2030_v53 = vld [vmem:[#allocation9 + $0xe8] sm:$0xff] }
  0x9a   :  { %356 = vmatmul.mubr.f32.gmra.mxu0 %v3842_v48  ;;  %744 = vmatpush1.msra.mxu1 %v680_v56 }
  0x9b   :  { %2949 = vmatmul.mubr.f32.gmra.mxu1 %v3850_v57  ;;  %361 = vmatprep.mubr.f32.mxu0 %v3671_v0 }
  0x9c   :  { %2951 = vmatprep.mubr.f32.mxu1 %v3852_v60  ;;  %2980 = vmatpush3.msra.mxu0 %v703_v52 }
  0x9d   :  { %2981 = vmatprep.subr.mxu0 %v700_v61  ;;  %745 = vmatprep.subr.mxu1 %v678_v1 }
  0x9e   :  { %362 = vmatmul.mubr.f32.gmra.mxu0 %v3844_v49  ;;  %746 = vmatpush1.msra.mxu1 %v677_v2  ;;  %v2044_v2 = vld [vmem:[#allocation9 + $0x158] sm:$0xff] }
  0x9f   :  { %2952 = vmatmul.mubr.f32.gmra.mxu1 %v3858_v4  ;;  %367 = vmatprep.mubr.f32.mxu0 %v3671_v0 }
  0xa0   :  { %2954 = vmatprep.mubr.f32.mxu1 %v3860_v5  ;;  %2982 = vmatpush3.msra.mxu0 %v700_v61 }
  0xa1   :  { %2983 = vmatprep.subr.mxu0 %v697_v6  ;;  %747 = vmatprep.subr.mxu1 %v675_v8 }
  0xa2   :  { %368 = vmatmul.mubr.f32.gmra.mxu0 %v3850_v57  ;;  %748 = vmatpush1.msra.mxu1 %v674_v9 }
  0xa3   :  { %2955 = vmatmul.mubr.f32.gmra.mxu1 %v3866_v10  ;;  %373 = vmatprep.mubr.f32.mxu0 %v3671_v0 }
  0xa4   :  { %2957 = vmatprep.mubr.f32.mxu1 %v3726_v34  ;;  %2984 = vmatpush3.msra.mxu0 %v697_v6 }
  0xa5   :  { %2985 = vmatprep.subr.mxu0 %v694_v12  ;;  %749 = vmatprep.subr.mxu1 %v672_v13 }
  0xa6   :  { %374 = vmatmul.mubr.f32.gmra.mxu0 %v3852_v60  ;;  %750 = vmatpush1.msra.mxu1 %v671_v14 }
  0xa7   :  { %2958 = vmatmul.mubr.f32.gmra.mxu1 %v3736_v39  ;;  %2986 = vmatpush3.msra.mxu0 %v694_v12 }
  0xa8   :  { %2987 = vmatprep.subr.mxu0 %v691_v15  ;;  %379 = vmatprep.mubr.f32.mxu0 %v3671_v0 }
  0xa9   :  { %2960 = vmatprep.mubr.f32.mxu1 %v3744_v43  ;;  %2988 = vmatpush3.msra.mxu0 %v691_v15 }
  0xaa   :  { %380 = vmatmul.mubr.f32.gmra.mxu0 %v3858_v4  ;;  %2989 = vmatprep.subr.mxu0 %v688_v17 }
  0xab   :  { %2961 = vmatmul.mubr.f32.gmra.mxu1 %v3752_v47  ;;  %2990 = vmatpush3.msra.mxu0 %v688_v17 }
  0xac   :  { %2991 = vmatprep.subr.mxu0 %v685_v18  ;;  %385 = vmatprep.mubr.f32.mxu0 %v3671_v0 }
  0xad   :  { %2963 = vmatprep.mubr.f32.mxu1 %v3760_v51  ;;  %2992 = vmatpush3.msra.mxu0 %v685_v18 }
  0xae   :  { %386 = vmatmul.mubr.f32.gmra.mxu0 %v3860_v5  ;;  %2993 = vmatprep.subr.mxu0 %v682_v19 }
  0xaf   :  { %2964 = vmatmul.mubr.f32.gmra.mxu1 %v3768_v55  ;;  %2994 = vmatpush3.msra.mxu0 %v682_v19 }
  0xb0   :  { %2995 = vmatprep.subr.mxu0 %v679_v21  ;;  %391 = vmatprep.mubr.f32.mxu0 %v3671_v0 }
  0xb1   :  { %2966 = vmatprep.mubr.f32.mxu1 %v3776_v59  ;;  %2996 = vmatpush3.msra.mxu0 %v679_v21 }
  0xb2   :  { %392 = vmatmul.mubr.f32.gmra.mxu0 %v3866_v10  ;;  %2997 = vmatprep.subr.mxu0 %v676_v22 }
  0xb3   :  { %2967 = vmatmul.mubr.f32.gmra.mxu1 %v3784_v63  ;;  %2998 = vmatpush3.msra.mxu0 %v676_v22 }
  0xb4   :  { %2999 = vmatprep.subr.mxu0 %v673_v23  ;;  %783 = vmatprep.mubr.f32.mxu1 %v3671_v0 }
  0xb5   :  { %3000 = vmatpush3.msra.mxu0 %v673_v23  ;;  %3001 = vmatprep.mubr.f32.mxu0 %v3724_v33 }
  0xb6   :  { %3002 = vmatmul.mubr.f32.vlgmr.msra.gmra.mxu0 %v3733_v38  ;;  %2049 = vmatprep.subr.mxu0 %v3671_v0 }
  0xb7   :  { %784 = vmatmul.mubr.f32.vlgmr.msra.gmra.mxu1 %v3724_v33  ;;  %3004 = vmatprep.mubr.f32.mxu0 %v3741_v42  ;;  %v2016_v33 = vld [vmem:[#allocation9 + $0x78] sm:$0xff] }
  0xb8   :  { %789 = vmatprep.mubr.f32.mxu1 %v3671_v0  ;;  %2050 = vmatpush1.msra.mxu0 %v2016_v33 }
  0xb9   :  { %2051 = vmatprep.subr.mxu0 %v3671_v0 }
  0xba   :  { %3005 = vmatmul.mubr.f32.gmra.mxu0 %v3749_v46 }
  0xbb   :  { %790 = vmatmul.mubr.f32.gmra.mxu1 %v3733_v38  ;;  %3007 = vmatprep.mubr.f32.mxu0 %v3757_v50  ;;  %v2015_v38 = vld [vmem:[#allocation9 + $0x70] sm:$0xff] }
  0xbc   :  { %795 = vmatprep.mubr.f32.mxu1 %v3671_v0  ;;  %2052 = vmatpush1.msra.mxu0 %v2015_v38 }
  0xbd   :  { %2053 = vmatprep.subr.mxu0 %v3671_v0 }
  0xbe   :  { %3008 = vmatmul.mubr.f32.gmra.mxu0 %v3765_v54 }
  0xbf   :  { %796 = vmatmul.mubr.f32.gmra.mxu1 %v3741_v42  ;;  %3010 = vmatprep.mubr.f32.mxu0 %v3773_v58  ;;  %v2014_v42 = vld [vmem:[#allocation9 + $0x68] sm:$0xff] }
  0xc0   :  { %801 = vmatprep.mubr.f32.mxu1 %v3671_v0  ;;  %2054 = vmatpush1.msra.mxu0 %v2014_v42 }
  0xc1   :  { %2055 = vmatprep.subr.mxu0 %v3671_v0 }
  0xc2   :  { %3011 = vmatmul.mubr.f32.gmra.mxu0 %v3781_v62 }
  0xc3   :  { %802 = vmatmul.mubr.f32.gmra.mxu1 %v3749_v46  ;;  %3013 = vmatprep.mubr.f32.mxu0 %v3789_v3  ;;  %v2013_v46 = vld [vmem:[#allocation9 + $0x60] sm:$0xff] }
  0xc4   :  { %807 = vmatprep.mubr.f32.mxu1 %v3671_v0  ;;  %2056 = vmatpush1.msra.mxu0 %v2013_v46 }
  0xc5   :  { %2057 = vmatprep.subr.mxu0 %v3671_v0 }
  0xc6   :  { %3014 = vmatmul.mubr.f32.gmra.mxu0 %v3795_v7 }
  0xc7   :  { %808 = vmatmul.mubr.f32.gmra.mxu1 %v3757_v50  ;;  %3016 = vmatprep.mubr.f32.mxu0 %v3802_v11  ;;  %v2012_v50 = vld [vmem:[#allocation9 + $0x58] sm:$0xff] }
  0xc8   :  { %813 = vmatprep.mubr.f32.mxu1 %v3671_v0  ;;  %2058 = vmatpush1.msra.mxu0 %v2012_v50 }
  0xc9   :  { %2059 = vmatprep.subr.mxu0 %v3671_v0 }
  0xca   :  { %3017 = vmatmul.mubr.f32.gmra.mxu0 %v3809_v16 }
  0xcb   :  { %814 = vmatmul.mubr.f32.gmra.mxu1 %v3765_v54  ;;  %3019 = vmatprep.mubr.f32.mxu0 %v3815_v20  ;;  %v2011_v54 = vld [vmem:[#allocation9 + $0x50] sm:$0xff] }
  0xcc   :  { %819 = vmatprep.mubr.f32.mxu1 %v3671_v0  ;;  %2060 = vmatpush1.msra.mxu0 %v2011_v54 }
  0xcd   :  { %2061 = vmatprep.subr.mxu0 %v3671_v0 }
  0xce   :  { %3020 = vmatmul.mubr.f32.gmra.mxu0 %v3821_v25 }
  0xcf   :  { %820 = vmatmul.mubr.f32.gmra.mxu1 %v3773_v58  ;;  %3022 = vmatprep.mubr.f32.mxu0 %v3827_v29  ;;  %v2010_v58 = vld [vmem:[#allocation9 + $0x48] sm:$0xff] }
  0xd0   :  { %825 = vmatprep.mubr.f32.mxu1 %v3671_v0  ;;  %2062 = vmatpush1.msra.mxu0 %v2010_v58 }
  0xd1   :  { %2063 = vmatprep.subr.mxu0 %v3671_v0 }
  0xd2   :  { %3023 = vmatmul.mubr.f32.gmra.mxu0 %v3833_v36 }
  0xd3   :  { %826 = vmatmul.mubr.f32.gmra.mxu1 %v3781_v62  ;;  %3025 = vmatprep.mubr.f32.mxu0 %v3836_v40  ;;  %v2009_v62 = vld [vmem:[#allocation9 + $0x40] sm:$0xff] }
  0xd4   :  { %831 = vmatprep.mubr.f32.mxu1 %v3671_v0  ;;  %2064 = vmatpush1.msra.mxu0 %v2009_v62 }
  0xd5   :  { %2065 = vmatprep.subr.mxu0 %v3671_v0 }
  0xd6   :  { %3026 = vmatmul.mubr.f32.gmra.mxu0 %v3842_v48 }
  0xd7   :  { %832 = vmatmul.mubr.f32.gmra.mxu1 %v3789_v3  ;;  %3028 = vmatprep.mubr.f32.mxu0 %v3844_v49  ;;  %v2048_v3 = vld [vmem:[#allocation9 + $0x178] sm:$0xff] }
  0xd8   :  { %837 = vmatprep.mubr.f32.mxu1 %v3671_v0  ;;  %3049 = vmatprep.subr.mxu1 %v2048_v3 }
  0xd9   :  { %3050 = vmatpush3.msra.mxu1 %v2048_v3 }
  0xda   :  { %3029 = vmatmul.mubr.f32.gmra.mxu0 %v3850_v57 }
  0xdb   :  { %838 = vmatmul.mubr.f32.gmra.mxu1 %v3795_v7  ;;  %3031 = vmatprep.mubr.f32.mxu0 %v3852_v60  ;;  %v2008_v7 = vld [vmem:[#allocation9 + $0x38] sm:$0xff] }
  0xdc   :  { %843 = vmatprep.mubr.f32.mxu1 %v3671_v0  ;;  %2066 = vmatpush1.msra.mxu0 %v2008_v7 }
  0xdd   :  { %2067 = vmatprep.subr.mxu0 %v3671_v0 }
  0xde   :  { %3032 = vmatmul.mubr.f32.gmra.mxu0 %v3858_v4 }
  0xdf   :  { %844 = vmatmul.mubr.f32.gmra.mxu1 %v3802_v11  ;;  %3034 = vmatprep.mubr.f32.mxu0 %v3860_v5  ;;  %v2047_v11 = vld [vmem:[#allocation9 + $0x170] sm:$0xff] }
  0xe0   :  { %849 = vmatprep.mubr.f32.mxu1 %v3671_v0  ;;  %3051 = vmatprep.subr.mxu1 %v2047_v11 }
  0xe1   :  { %3052 = vmatpush3.msra.mxu1 %v2047_v11 }
  0xe2   :  { %3035 = vmatmul.mubr.f32.gmra.mxu0 %v3866_v10  ;;  %3053 = vmatprep.subr.mxu1 %v2046_v26 }
  0xe3   :  { %850 = vmatmul.mubr.f32.gmra.mxu1 %v3809_v16  ;;  %3037 = vmatprep.mubr.f32.mxu0 %v3726_v34  ;;  %v2007_v16 = vld [vmem:[#allocation9 + $0x30] sm:$0xff] }
  0xe4   :  { %855 = vmatprep.mubr.f32.mxu1 %v3671_v0  ;;  %2068 = vmatpush1.msra.mxu0 %v2007_v16 }
  0xe5   :  { %2069 = vmatprep.subr.mxu0 %v3671_v0  ;;  %3054 = vmatpush3.msra.mxu1 %v2046_v26 }
  0xe6   :  { %3038 = vmatmul.mubr.f32.gmra.mxu0 %v3736_v39  ;;  %3055 = vmatprep.subr.mxu1 %v2045_v27 }
  0xe7   :  { %856 = vmatmul.mubr.f32.gmra.mxu1 %v3815_v20  ;;  %3040 = vmatprep.mubr.f32.mxu0 %v3744_v43  ;;  %v2006_v20 = vld [vmem:[#allocation9 + $0x28] sm:$0xff] }
  0xe8   :  { %861 = vmatprep.mubr.f32.mxu1 %v3671_v0  ;;  %2070 = vmatpush1.msra.mxu0 %v2006_v20 }
  0xe9   :  { %2071 = vmatprep.subr.mxu0 %v3671_v0  ;;  %3056 = vmatpush3.msra.mxu1 %v2045_v27 }
  0xea   :  { %3041 = vmatmul.mubr.f32.gmra.mxu0 %v3752_v47  ;;  %3057 = vmatprep.subr.mxu1 %v2044_v2 }
  0xeb   :  { %862 = vmatmul.mubr.f32.gmra.mxu1 %v3821_v25  ;;  %3043 = vmatprep.mubr.f32.mxu0 %v3760_v51  ;;  %v2004_v25 = vld [vmem:[#allocation9 + $0x18] sm:$0xff] }
  0xec   :  { %867 = vmatprep.mubr.f32.mxu1 %v3671_v0  ;;  %2072 = vmatpush1.msra.mxu0 %v2005_v24 }
  0xed   :  { %2073 = vmatprep.subr.mxu0 %v3671_v0  ;;  %3058 = vmatpush3.msra.mxu1 %v2044_v2 }
  0xee   :  { %3044 = vmatmul.mubr.f32.gmra.mxu0 %v3768_v55 }
  0xef   :  { %868 = vmatmul.mubr.f32.gmra.mxu1 %v3827_v29  ;;  %3046 = vmatprep.mubr.f32.mxu0 %v3776_v59 }
  0xf0   :  { %873 = vmatprep.mubr.f32.mxu1 %v3671_v0  ;;  %2074 = vmatpush1.msra.mxu0 %v2004_v25 }
  0xf1   :  { %2075 = vmatprep.subr.mxu0 %v3671_v0 }
  0xf2   :  { %3047 = vmatmul.mubr.f32.gmra.mxu0 %v3784_v63 }
  0xf3   :  { %874 = vmatmul.mubr.f32.gmra.mxu1 %v3833_v36  ;;  %2076 = vmatpush1.msra.mxu0 %v2003_v30  ;;  %v2027_v30 = vld [vmem:[#allocation9 + $0xd0] sm:$0xff] }
  0xf4   :  { %879 = vmatprep.mubr.f32.mxu1 %v3671_v0  ;;  %2077 = vmatprep.subr.mxu0 %v3671_v0 }
  0xf5   :  { %2078 = vmatpush1.msra.mxu0 %v2002_v35 }
  0xf6   :  { %2079 = vmatprep.subr.mxu0 %v3671_v0 }
  0xf7   :  { %880 = vmatmul.mubr.f32.gmra.mxu1 %v3836_v40 }
  0xf8   :  { %885 = vmatprep.mubr.f32.mxu1 %v3671_v0 }
  0xfb   :  { %886 = vmatmul.mubr.f32.gmra.mxu1 %v3842_v48 }
  0xfc   :  { %891 = vmatprep.mubr.f32.mxu1 %v3671_v0 }
  0xff   :  { %892 = vmatmul.mubr.f32.gmra.mxu1 %v3844_v49 }
 0x100   :  { %897 = vmatprep.mubr.f32.mxu1 %v3671_v0 }
 0x103   :  { %898 = vmatmul.mubr.f32.gmra.mxu1 %v3850_v57 }
 0x104   :  { %903 = vmatprep.mubr.f32.mxu1 %v3671_v0 }
 0x107   :  { %904 = vmatmul.mubr.f32.gmra.mxu1 %v3852_v60 }
 0x108   :  { %909 = vmatprep.mubr.f32.mxu1 %v3671_v0 }
 0x10b   :  { %910 = vmatmul.mubr.f32.gmra.mxu1 %v3858_v4 }
 0x10c   :  { %915 = vmatprep.mubr.f32.mxu1 %v3671_v0 }
 0x10f   :  { %916 = vmatmul.mubr.f32.gmra.mxu1 %v3860_v5  ;;  %v2028_v5 = vld [vmem:[#allocation9 + $0xd8] sm:$0xff] }
 0x110   :  { %921 = vmatprep.mubr.f32.mxu1 %v3671_v0 }
 0x113   :  { %922 = vmatmul.mubr.f32.gmra.mxu1 %v3866_v10 }
 0x114   :  { %927 = vmatprep.mubr.f32.mxu1 %v3671_v0 }
 0x116   :  { %v3981_v28 = vpop.f32.mrf.mxu0  ;;  %v3983_v29 = vpop.f32.mrf.mxu1 }
 0x117   :  { %4693 = vst [vmem:[#allocation16_spill] sm:$0xff] %v3983_v29  ;;  %928 = vmatmul.mubr.f32.gmra.mxu1 %v3726_v34  ;;  %v2001_v34 = vld [vmem:[#allocation9] sm:$0xff]  ;;  %v2649_v57 = vmul.f32 -1.442695, %v3981_v28  ;;  %v2721_v61 = vmul.f32 -1.442695, %v3983_v29 }
 0x118   :  { %v3986_v31 = vpop.f32.mrf.mxu0  ;;  %v3988_v32 = vpop.f32.mrf.mxu1  ;;  %933 = vmatprep.mubr.f32.mxu1 %v3671_v0  ;;  %2080 = vmatpush1.msra.mxu0 %v2001_v34 }
 0x119   :  { %4694 = vst [vmem:[#allocation17_spill] sm:$0xff] %v3988_v32  ;;  %2081 = vmatprep.subr.mxu0 %v3671_v0  ;;  %3171 = vpow2.f32 %v2649_v57  ;;  %v2650_v10 = vmul.f32 -1.442695, %v3986_v31  ;;  %v2722_v13 = vmul.f32 -1.442695, %v3988_v32  ;;  %v2026_v57 = vld [vmem:[#allocation9 + $0xc8] sm:$0xff] }
 0x11a   :  { %v3992_v36 = vpop.f32.mrf.mxu0  ;;  %2082 = vmatpush2.msra.mxu0 %v2032_v44  ;;  %3173 = vpow2.f32 %v2721_v61  ;;  %v2042_v44 = vld [vmem:[#allocation9 + $0x148] sm:$0xff] }
 0x11b   :  { %v3994_v37 = vpop.f32.mrf.mxu1  ;;  %934 = vmatmul.mubr.f32.gmra.mxu1 %v3736_v39  ;;  %2083 = vmatprep.subr.mxu0 %v3671_v0  ;;  %v2031_v39 = vld [vmem:[#allocation9 + $0xf0] sm:$0xff]  ;;  %v2652_v15 = vmul.f32 -1.442695, %v3992_v36  ;;  %3175 = vpow2.f32 %v2650_v10  ;;  %v2018_v32 = vld [vmem:[#allocation9 + $0x88] sm:$0xff] }
 0x11c   :  { %4695 = vst [vmem:[#allocation18_spill] sm:$0xff] %v3994_v37  ;;  %v3998_v40 = vpop.f32.mrf.mxu0  ;;  %939 = vmatprep.mubr.f32.mxu1 %v3671_v0  ;;  %2084 = vmatpush2.msra.mxu0 %v2031_v39  ;;  %v2724_v17 = vmul.f32 -1.442695, %v3994_v37  ;;  %3177 = vpow2.f32 %v2722_v13  ;;  %v2020_v37 = vld [vmem:[#allocation9 + $0x98] sm:$0xff] }
 0x11d   :  { %v4001_v41 = vpop.f32.mrf.mxu1  ;;  %2085 = vmatprep.subr.mxu0 %v3671_v0  ;;  %v2653_v19 = vmul.f32 -1.442695, %v3998_v40  ;;  %3179 = vpow2.f32 %v2652_v15  ;;  %v2025_v15 = vld [vmem:[#allocation9 + $0xc0] sm:$0xff] }
 0x11e   :  { %4696 = vst [vmem:[#allocation19_spill] sm:$0xff] %v4001_v41  ;;  %v4004_v45 = vpop.f32.mrf.mxu0  ;;  %2086 = vmatpush2.msra.mxu0 %v2030_v53  ;;  %v2725_v22 = vmul.f32 -1.442695, %v4001_v41  ;;  %3181 = vpow2.f32 %v2724_v17 }
 0x11f   :  { %v4006_v48 = vpop.f32.mrf.mxu1  ;;  %940 = vmatmul.mubr.f32.gmra.mxu1 %v3744_v43  ;;  %2087 = vmatprep.subr.mxu0 %v3671_v0  ;;  %v2029_v43 = vld [vmem:[#allocation9 + $0xe0] sm:$0xff]  ;;  %v2655_v33 = vmul.f32 -1.442695, %v4004_v45  ;;  %3183 = vpow2.f32 %v2653_v19 }
 0x120   :  { %4697 = vst [vmem:[#allocation20_spill] sm:$0xff] %v4006_v48  ;;  %v4010_v49 = vpop.f32.mrf.mxu0  ;;  %945 = vmatprep.mubr.f32.mxu1 %v3671_v0  ;;  %2088 = vmatpush2.msra.mxu0 %v2029_v43  ;;  %v2727_v38 = vmul.f32 -1.442695, %v4006_v48  ;;  %3185 = vpow2.f32 %v2725_v22 }
 0x121   :  { %v4013_v52 = vpop.f32.mrf.mxu1  ;;  %2089 = vmatprep.subr.mxu0 %v3671_v0  ;;  %v2656_v46 = vmul.f32 -1.442695, %v4010_v49  ;;  %3187 = vpow2.f32 %v2655_v33  ;;  %v2040_v33 = vld [vmem:[#allocation9 + $0x138] sm:$0xff] }
 0x122   :  { %4698 = vst [vmem:[#allocation21_spill] sm:$0xff] %v4013_v52  ;;  %v4016_v56 = vpop.f32.mrf.mxu0  ;;  %2090 = vmatpush2.msra.mxu0 %v2028_v5  ;;  %v2728_v54 = vmul.f32 -1.442695, %v4013_v52  ;;  %3189 = vpow2.f32 %v2727_v38  ;;  %v2041_v5 = vld [vmem:[#allocation9 + $0x140] sm:$0xff] }
 0x123   :  { %v4019_v60 = vpop.f32.mrf.mxu1  ;;  %946 = vmatmul.mubr.f32.gmra.mxu1 %v3752_v47  ;;  %v2043_v47 = vld [vmem:[#allocation9 + $0x150] sm:$0xff]  ;;  %2091 = vmatprep.subr.mxu0 %v3671_v0  ;;  %3191 = vpow2.f32 %v2656_v46 }
 0x124   :  { %4699 = vst [vmem:[#allocation22_spill] sm:$0xff] %v4019_v60  ;;  %v4024_v1 = vpop.f32.mrf.mxu0  ;;  %951 = vmatprep.mubr.f32.mxu1 %v3671_v0  ;;  %3059 = vmatprep.subr.mxu1 %v2043_v47  ;;  %v2730_v7 = vmul.f32 -1.442695, %v4019_v60  ;;  %3193 = vpow2.f32 %v2728_v54  ;;  %v2021_v60 = vld [vmem:[#allocation9 + $0xa0] sm:$0xff] }
 0x125   :  { %v4027_v4 = vpop.f32.mrf.mxu1  ;;  %3060 = vmatpush3.msra.mxu1 %v2043_v47  ;;  %v2659_v20 = vmul.f32 -1.442695, %v4024_v1  ;;  %2092 = vmatpush2.msra.mxu0 %v2027_v30 }
 0x126   :  { %4700 = vst [vmem:[#allocation23_spill] sm:$0xff] %v4027_v4  ;;  %v4030_v6 = vpop.f32.mrf.mxu0  ;;  %v3172_v3 = vpop.eup %3171  ;;  %v2731_v25 = vmul.f32 -1.442695, %v4027_v4  ;;  %2093 = vmatprep.subr.mxu0 %v3671_v0  ;;  %3061 = vmatprep.subr.mxu1 %v2042_v44 }
 0x127   :  { %v4032_v8 = vpop.f32.mrf.mxu1  ;;  %952 = vmatmul.mubr.f32.gmra.mxu1 %v3760_v51  ;;  %v3174_v16 = vpop.eup %3173  ;;  %v1489_v27 = vadd.f32 1.0, %v3172_v3  ;;  %v2661_v39 = vmul.f32 -1.442695, %v4030_v6  ;;  %2094 = vmatpush2.msra.mxu0 %v2026_v57 }
 0x128   :  { %4701 = vst [vmem:[#allocation24_spill] sm:$0xff] %v4032_v8  ;;  %v4035_v9 = vpop.f32.mrf.mxu0  ;;  %957 = vmatprep.mubr.f32.mxu1 %v3671_v0  ;;  %v1561_v35 = vadd.f32 1.0, %v3174_v16  ;;  %v3176_v43 = vpop.eup %3175  ;;  %3062 = vmatpush3.msra.mxu1 %v2042_v44 }
 0x129   :  { %v4039_v12 = vpop.f32.mrf.mxu1  ;;  %v2662_v61 = vmul.f32 -1.442695, %v4035_v9  ;;  %v3178_v47 = vpop.eup %3177  ;;  %2095 = vmatprep.subr.mxu0 %v3671_v0  ;;  %3063 = vmatprep.subr.mxu1 %v2041_v5 }
 0x12a   :  { %4702 = vst [vmem:[#allocation25_spill] sm:$0xff] %v4039_v12  ;;  %v4043_v14 = vpop.f32.mrf.mxu0  ;;  %v3180_v17 = vpop.eup %3179  ;;  %2096 = vmatpush2.msra.mxu0 %v2025_v15  ;;  %3064 = vmatpush3.msra.mxu1 %v2041_v5  ;;  %v2022_v15 = vld [vmem:[#allocation9 + $0xa8] sm:$0xff] }
 0x12b   :  { %v4046_v51 = vpop.f32.mrf.mxu1  ;;  %958 = vmatmul.mubr.f32.gmra.mxu1 %v3768_v55  ;;  %v2664_v10 = vmul.f32 -1.442695, %v4043_v14  ;;  %v4104_v38 = vpop.eup %3181  ;;  %2097 = vmatprep.subr.mxu0 %v3671_v0 }
 0x12c   :  { %4703 = vst [vmem:[#allocation26_spill] sm:$0xff] %v4046_v51  ;;  %v4050_v18 = vpop.f32.mrf.mxu0  ;;  %963 = vmatprep.mubr.f32.mxu1 %v3671_v0  ;;  %4717 = vst [vmem:[#allocation40_spill] sm:$0xff] %v4104_v38  ;;  %3065 = vmatprep.subr.mxu1 %v2040_v33  ;;  %v3184_v3 = vpop.eup %3183 }
 0x12d   :  { %v4054_v21 = vpop.f32.mrf.mxu1  ;;  %v2665_v19 = vmul.f32 -1.442695, %v4050_v18  ;;  %3066 = vmatpush3.msra.mxu1 %v2040_v33 }
 0x12e   :  { %4704 = vst [vmem:[#allocation27_spill] sm:$0xff] %v4054_v21  ;;  %v4057_v23 = vpop.f32.mrf.mxu0 }
 0x12f   :  { %4705 = vst [vmem:[#allocation28_spill] sm:$0xff] %v4057_v23  ;;  %v4060_v55 = vpop.f32.mrf.mxu1  ;;  %964 = vmatmul.mubr.f32.gmra.mxu1 %v3776_v59  ;;  %v2658_v59 = vmul.f32 -1.442695, %v4016_v56  ;;  %v2667_v46 = vmul.f32 -1.442695, %v4057_v23 }
 0x130   :  { %4706 = vst [vmem:[#allocation29_spill] sm:$0xff] %v4060_v55  ;;  %v4064_v42 = vpop.f32.mrf.mxu0  ;;  %969 = vmatprep.mubr.f32.mxu1 %v3671_v0 }
 0x131   :  { %4707 = vst [vmem:[#allocation30_spill] sm:$0xff] %v4064_v42  ;;  %v4068_v50 = vpop.f32.mrf.mxu1  ;;  %3195 = vpow2.f32 %v2658_v59  ;;  %v2024_v59 = vld [vmem:[#allocation9 + $0xb8] sm:$0xff] }
 0x132   :  { %4708 = vst [vmem:[#allocation31_spill] sm:$0xff] %v4068_v50  ;;  %v4071_v58 = vpop.f32.mrf.mxu0  ;;  %3197 = vpow2.f32 %v2730_v7  ;;  %v1490_v7 = vadd.f32 1.0, %v3176_v43  ;;  %2098 = vmatpush2.msra.mxu0 %v2024_v59  ;;  %v2038_v43 = vld [vmem:[#allocation9 + $0x128] sm:$0xff]  ;;  %v2037_v59 = vld [vmem:[#allocation9 + $0x120] sm:$0xff] }
 0x133   :  { %4709 = vst [vmem:[#allocation32_spill] sm:$0xff] %v4071_v58  ;;  %v4074_v62 = vpop.f32.mrf.mxu1  ;;  %970 = vmatmul.mubr.f32.gmra.mxu1 %v3784_v63  ;;  %3199 = vpow2.f32 %v2659_v20  ;;  %v2039_v20 = vld [vmem:[#allocation9 + $0x130] sm:$0xff]  ;;  %2099 = vmatprep.subr.mxu0 %v3671_v0  ;;  %v2670_v5 = vmul.f32 -1.442695, %v4071_v58 }
 0x134   :  { %4710 = vst [vmem:[#allocation33_spill] sm:$0xff] %v4074_v62  ;;  %v4078_v11 = vpop.f32.mrf.mxu0  ;;  %3201 = vpow2.f32 %v2731_v25  ;;  %v3186_v25 = vpop.eup %3185  ;;  %3067 = vmatprep.subr.mxu1 %v2039_v20 }
 0x135   :  { %4711 = vst [vmem:[#allocation34_spill] sm:$0xff] %v4078_v11  ;;  %v4081_v24 = vpop.f32.mrf.mxu1  ;;  %3203 = vrcp.f32 %v1489_v27  ;;  %v2668_v27 = vmul.f32 -1.442695, %v4064_v42  ;;  %v3188_v44 = vpop.eup %3187  ;;  %3068 = vmatpush3.msra.mxu1 %v2039_v20  ;;  %v1565_v4 = vadd.f32 1.0, %v3186_v25 }
 0x136   :  { %4712 = vst [vmem:[#allocation35_spill] sm:$0xff] %v4081_v24  ;;  %v4084_v26 = vpop.f32.mrf.mxu0  ;;  %3205 = vrcp.f32 %v1561_v35  ;;  %v2023_v35 = vld [vmem:[#allocation9 + $0xb0] sm:$0xff]  ;;  %3069 = vmatprep.subr.mxu1 %v2038_v43  ;;  %v1495_v29 = vadd.f32 1.0, %v3188_v44 }
 0x137   :  { %4713 = vst [vmem:[#allocation36_spill] sm:$0xff] %v4084_v26  ;;  %v4086_v63 = vpop.f32.mrf.mxu1  ;;  %3207 = vpow2.f32 %v2661_v39  ;;  %v1562_v39 = vadd.f32 1.0, %v3178_v47  ;;  %2100 = vmatpush2.msra.mxu0 %v2023_v35  ;;  %v1492_v47 = vadd.f32 1.0, %v3180_v17  ;;  %3070 = vmatpush3.msra.mxu1 %v2038_v43  ;;  %v2036_v43 = vld [vmem:[#allocation9 + $0x118] sm:$0xff] }
 0x138   :  { %v4088_v34 = vpop.f32.mrf.mxu0  ;;  %3209 = vpow2.f32 %v2662_v61  ;;  %v4118_v61 = vpop.eup %3189  ;;  %2101 = vmatprep.subr.mxu0 %v3671_v0  ;;  %3071 = vmatprep.subr.mxu1 %v2037_v59 }
 0x139   :  { %4714 = vst [vmem:[#allocation37_spill] sm:$0xff] %v4088_v34  ;;  %v4091_v53 = vpop.f32.mrf.mxu1  ;;  %3211 = vpow2.f32 %v2664_v10  ;;  %4720 = vst [vmem:[#allocation43_spill] sm:$0xff] %v4118_v61  ;;  %v3192_v33 = vpop.eup %3191  ;;  %2102 = vmatpush2.msra.mxu0 %v2022_v15  ;;  %3072 = vmatpush3.msra.mxu1 %v2037_v59 }
 0x13a   :  { %v4095_v2 = vpop.f32.mrf.mxu0  ;;  %3213 = vpow2.f32 %v2665_v19  ;;  %v4126_v20 = vpop.eup %3193  ;;  %2103 = vmatprep.subr.mxu0 %v3671_v0  ;;  %3073 = vmatprep.subr.mxu1 %v2036_v43  ;;  %v1496_v59 = vadd.f32 1.0, %v3192_v33 }
 0x13b   :  { %4715 = vst [vmem:[#allocation38_spill] sm:$0xff] %v4095_v2  ;;  %v4098_v13 = vpop.f32.mrf.mxu1  ;;  %3215 = vpow2.f32 %v2667_v46  ;;  %4722 = vst [vmem:[#allocation45_spill] sm:$0xff] %v4126_v20  ;;  %v2671_v46 = vmul.f32 -1.442695, %v4078_v11  ;;  %2104 = vmatpush2.msra.mxu0 %v2021_v60  ;;  %3074 = vmatpush3.msra.mxu1 %v2036_v43  ;;  %v2035_v60 = vld [vmem:[#allocation9 + $0x110] sm:$0xff] }
 0x13c   :  { %v4102_v22 = vpop.f32.mrf.mxu0  ;;  %3217 = vrcp.f32 %v1490_v7  ;;  %v1493_v7 = vadd.f32 1.0, %v3184_v3  ;;  %2105 = vmatprep.subr.mxu0 %v3671_v0  ;;  %3075 = vmatprep.subr.mxu1 %v2035_v60 }
 0x13d   :  { %4716 = vst [vmem:[#allocation39_spill] sm:$0xff] %v4102_v22  ;;  %v4107_v54 = vpop.f32.mrf.mxu1  ;;  %3219 = vpow2.f32 %v2668_v27  ;;  %2106 = vmatpush2.msra.mxu0 %v2020_v37  ;;  %3076 = vmatpush3.msra.mxu1 %v2035_v60  ;;  %v2034_v37 = vld [vmem:[#allocation9 + $0x108] sm:$0xff]  ;;  %v2033_v60 = vld [vmem:[#allocation9 + $0x100] sm:$0xff] }
 0x13e   :  { %v4110_v16 = vpop.f32.mrf.mxu0  ;;  %v3196_v48 = vpop.eup %3195  ;;  %3221 = vrcp.f32 %v1562_v39  ;;  %2107 = vmatprep.subr.mxu0 %v3671_v0  ;;  %3077 = vmatprep.subr.mxu1 %v2034_v37 }
 0x13f   :  { %4718 = vst [vmem:[#allocation41_spill] sm:$0xff] %v4110_v16  ;;  %v4113_v30 = vpop.f32.mrf.mxu1  ;;  %v4134_v15 = vpop.eup %3197  ;;  %3223 = vpow2.f32 %v2670_v5  ;;  %v2019_v5 = vld [vmem:[#allocation9 + $0x90] sm:$0xff]  ;;  %3078 = vmatpush3.msra.mxu1 %v2034_v37 }
 0x140   :  { %v4116_v57 = vpop.f32.mrf.mxu0  ;;  %4724 = vst [vmem:[#allocation47_spill] sm:$0xff] %v4134_v15  ;;  %v3200_v52 = vpop.eup %3199  ;;  %3225 = vrcp.f32 %v1492_v47  ;;  %v1498_v47 = vadd.f32 1.0, %v3196_v48  ;;  %2108 = vmatpush2.msra.mxu0 %v2019_v5  ;;  %3079 = vmatprep.subr.mxu1 %v2033_v60 }
 0x141   :  { %4719 = vst [vmem:[#allocation42_spill] sm:$0xff] %v4116_v57  ;;  %v4121_v10 = vpop.f32.mrf.mxu1  ;;  %v4141_v3 = vpop.eup %3201  ;;  %3227 = vpow2.f32 %v2671_v46  ;;  %v1499_v33 = vadd.f32 1.0, %v3200_v52  ;;  %2109 = vmatprep.subr.mxu0 %v3671_v0  ;;  %3080 = vmatpush3.msra.mxu1 %v2033_v60 }
 0x142   :  { %v4124_v19 = vpop.f32.mrf.mxu0  ;;  %4726 = vst [vmem:[#allocation49_spill] sm:$0xff] %v4141_v3  ;;  %v4146_v41 = vpop.eup %3203  ;;  %3229 = vrcp.f32 %v1493_v7  ;;  %v2733_v7 = vmul.f32 -1.442695, %v4032_v8  ;;  %2110 = vmatpush2.msra.mxu0 %v2018_v32 }
 0x143   :  { %4721 = vst [vmem:[#allocation44_spill] sm:$0xff] %v4124_v19  ;;  %v4129_v35 = vpop.f32.mrf.mxu1  ;;  %v4150_v43 = vpop.eup %3205  ;;  %3231 = vrcp.f32 %v1565_v4  ;;  %v2734_v4 = vmul.f32 -1.442695, %v4039_v12  ;;  %2111 = vmatprep.subr.mxu0 %v3671_v0 }
 0x144   :  { %v4132_v17 = vpop.f32.mrf.mxu0  ;;  %4729 = vst [vmem:[#allocation52_spill] sm:$0xff] %v4150_v43  ;;  %v3208_v15 = vpop.eup %3207  ;;  %3233 = vrcp.f32 %v1495_v29  ;;  %v2017_v43 = vld [vmem:[#allocation9 + $0x80] sm:$0xff]  ;;  %v2737_v29 = vmul.f32 -1.442695, %v4054_v21 }
 0x145   :  { %4723 = vst [vmem:[#allocation46_spill] sm:$0xff] %v4132_v17  ;;  %v4136_v27 = vpop.f32.mrf.mxu1  ;;  %v3210_v5 = vpop.eup %3209  ;;  %3235 = vrcp.f32 %v1496_v59  ;;  %2112 = vmatpush2.msra.mxu0 %v2017_v43  ;;  %v1501_v37 = vadd.f32 1.0, %v3208_v15 }
 0x146   :  { %v4139_v39 = vpop.f32.mrf.mxu0  ;;  %v3212_v62 = vpop.eup %3211  ;;  %3237 = vrcp.f32 %v1498_v47  ;;  %v1502_v3 = vadd.f32 1.0, %v3210_v5 }
 0x147   :  { %4725 = vst [vmem:[#allocation48_spill] sm:$0xff] %v4139_v39  ;;  %v4143_v25 = vpop.f32.mrf.mxu1  ;;  %v3214_v32 = vpop.eup %3213  ;;  %3239 = vrcp.f32 %v1499_v33  ;;  %v1504_v47 = vadd.f32 1.0, %v3212_v62 }
 0x148   :  { %4727 = vst [vmem:[#allocation50_spill] sm:$0xff] %v4143_v25  ;;  %v4148_v44 = vpop.f32.mrf.mxu0  ;;  %v3216_v12 = vpop.eup %3215  ;;  %3241 = vpow2.f32 %v2733_v7  ;;  %v1505_v24 = vadd.f32 1.0, %v3214_v32 }
 0x149   :  { %4728 = vst [vmem:[#allocation51_spill] sm:$0xff] %v4148_v44  ;;  %v4152_v46 = vpop.f32.mrf.mxu1  ;;  %v4169_v0 = vpop.eup %3217  ;;  %3243 = vpow2.f32 %v2734_v4  ;;  %v1507_v15 = vadd.f32 1.0, %v3216_v12 }
 0x14a   :  { %4730 = vst [vmem:[#allocation53_spill] sm:$0xff] %v4152_v46  ;;  %v4156_v48 = vpop.f32.mrf.mxu0  ;;  %v3220_v21 = vpop.eup %3219  ;;  %3245 = vpow2.f32 %v2737_v29 }
 0x14b   :  { %4731 = vst [vmem:[#allocation54_spill] sm:$0xff] %v4156_v48  ;;  %v4159_v52 = vpop.f32.mrf.mxu1  ;;  %v4175_v33 = vpop.eup %3221  ;;  %3247 = vrcp.f32 %v1501_v37  ;;  %v1508_v5 = vadd.f32 1.0, %v3220_v21  ;;  %v2673_v37 = vmul.f32 -1.442695, %v4084_v26 }
 0x14c   :  { %v4163_v8 = vpop.f32.mrf.mxu0  ;;  %4732 = vst [vmem:[#allocation55_spill] sm:$0xff] %v4175_v33  ;;  %v3224_v7 = vpop.eup %3223  ;;  %3249 = vrcp.f32 %v1502_v3 }
 0x14d   :  { %v4165_v59 = vpop.f32.mrf.mxu1  ;;  %v4181_v4 = vpop.eup %3225  ;;  %3251 = vrcp.f32 %v1504_v47  ;;  %v1510_v62 = vadd.f32 1.0, %v3224_v7  ;;  %v2654_v47 = vmul.f32 -1.442695, %v4086_v63 }
 0x14e   :  { %v4167_v61 = vpop.f32.mrf.mxu0  ;;  %v3228_v29 = vpop.eup %3227  ;;  %3253 = vrcp.f32 %v1505_v24  ;;  %v2674_v24 = vmul.f32 -1.442695, %v4088_v34 }
 0x14f   :  { %v4171_v55 = vpop.f32.mrf.mxu1  ;;  %v4187_v33 = vpop.eup %3229  ;;  %3255 = vrcp.f32 %v1507_v15  ;;  %v1511_v12 = vadd.f32 1.0, %v3228_v29  ;;  %v2651_v29 = vmul.f32 -1.442695, %v4091_v53 }
 0x150   :  { %v4173_v43 = vpop.f32.mrf.mxu0  ;;  %v4192_v21 = vpop.eup %3231  ;;  %3257 = vrcp.f32 %v1508_v5  ;;  %v2676_v5 = vmul.f32 -1.442695, %v4095_v2 }
 0x151   :  { %v4177_v60 = vpop.f32.mrf.mxu1  ;;  %4733 = vst [vmem:[#allocation56_spill] sm:$0xff] %v4192_v21  ;;  %v4197_v51 = vpop.eup %3233  ;;  %3259 = vrcp.f32 %v1510_v62  ;;  %v2660_v62 = vmul.f32 -1.442695, %v4098_v13 }
 0x152   :  { %v4179_v20 = vpop.f32.mrf.mxu0  ;;  %v4202_v15 = vpop.eup %3235  ;;  %3261 = vrcp.f32 %v1511_v12  ;;  %v2677_v12 = vmul.f32 -1.442695, %v4102_v22 }
 0x153   :  { %v4183_v38 = vpop.f32.mrf.mxu1  ;;  %v4207_v21 = vpop.eup %3237  ;;  %3263 = vpow2.f32 %v2673_v37  ;;  %v2657_v37 = vmul.f32 -1.442695, %v4107_v54 }
 0x154   :  { %v4185_v32 = vpop.f32.mrf.mxu0  ;;  %v4212_v58 = vpop.eup %3239  ;;  %3265 = vpow2.f32 %v2654_v47  ;;  %v2679_v47 = vmul.f32 -1.442695, %v4110_v16 }
 0x155   :  { %v4190_v3 = vpop.f32.mrf.mxu1  ;;  %3267 = vpow2.f32 %v2674_v24  ;;  %v2666_v24 = vmul.f32 -1.442695, %v4113_v30 }
 0x156   :  { %v4195_v7 = vpop.f32.mrf.mxu0  ;;  %3269 = vpow2.f32 %v2651_v29  ;;  %v2680_v29 = vmul.f32 -1.442695, %v4116_v57 }
 0x157   :  { %4734 = vst [vmem:[#allocation57_spill] sm:$0xff] %v4195_v7  ;;  %v4200_v50 = vpop.f32.mrf.mxu1  ;;  %3271 = vpow2.f32 %v2676_v5  ;;  %v2663_v5 = vmul.f32 -1.442695, %v4121_v10 }
 0x158   :  { %4735 = vst [vmem:[#allocation58_spill] sm:$0xff] %v4200_v50  ;;  %v4205_v26 = vpop.f32.mrf.mxu0  ;;  %v4217_v50 = vpop.eup %3241  ;;  %3273 = vpow2.f32 %v2660_v62  ;;  %v2682_v62 = vmul.f32 -1.442695, %v4124_v19 }
 0x159   :  { %4736 = vst [vmem:[#allocation59_spill] sm:$0xff] %v4205_v26  ;;  %v4210_v7 = vpop.f32.mrf.mxu1  ;;  %4739 = vst [vmem:[#allocation62_spill] sm:$0xff] %v4217_v50  ;;  %v4222_v11 = vpop.eup %3243  ;;  %3275 = vpow2.f32 %v2677_v12  ;;  %v2672_v12 = vmul.f32 -1.442695, %v4129_v35 }
 0x15a   :  { %4737 = vst [vmem:[#allocation60_spill] sm:$0xff] %v4210_v7  ;;  %v4215_v34 = vpop.f32.mrf.mxu0  ;;  %4741 = vst [vmem:[#allocation64_spill] sm:$0xff] %v4222_v11  ;;  %v4227_v7 = vpop.eup %3245  ;;  %3277 = vpow2.f32 %v2657_v37  ;;  %v2683_v37 = vmul.f32 -1.442695, %v4132_v17 }
 0x15b   :  { %4738 = vst [vmem:[#allocation61_spill] sm:$0xff] %v4215_v34  ;;  %v4220_v26 = vpop.f32.mrf.mxu1  ;;  %4743 = vst [vmem:[#allocation66_spill] sm:$0xff] %v4227_v7  ;;  %v4232_v50 = vpop.eup %3247  ;;  %3279 = vpow2.f32 %v2679_v47  ;;  %v2669_v47 = vmul.f32 -1.442695, %v4136_v27 }
 0x15c   :  { %4740 = vst [vmem:[#allocation63_spill] sm:$0xff] %v4220_v26  ;;  %v4225_v2 = vpop.f32.mrf.mxu0  ;;  %v4237_v11 = vpop.eup %3249  ;;  %3281 = vpow2.f32 %v2666_v24 }
 0x15d   :  { %4742 = vst [vmem:[#allocation65_spill] sm:$0xff] %v4225_v2  ;;  %v4230_v34 = vpop.f32.mrf.mxu1  ;;  %v4242_v7 = vpop.eup %3251  ;;  %3283 = vpow2.f32 %v2680_v29 }
 0x15e   :  { %4744 = vst [vmem:[#allocation67_spill] sm:$0xff] %v4230_v34  ;;  %v4235_v22 = vpop.f32.mrf.mxu0  ;;  %v4247_v34 = vpop.eup %3253  ;;  %3285 = vpow2.f32 %v2663_v5 }
 0x15f   :  { %4745 = vst [vmem:[#allocation68_spill] sm:$0xff] %v4235_v22  ;;  %v4240_v2 = vpop.f32.mrf.mxu1  ;;  %v4252_v26 = vpop.eup %3255  ;;  %3287 = vpow2.f32 %v2682_v62 }
 0x160   :  { %4746 = vst [vmem:[#allocation69_spill] sm:$0xff] %v4240_v2  ;;  %v4245_v16 = vpop.f32.mrf.mxu0  ;;  %4749 = vst [vmem:[#allocation72_spill] sm:$0xff] %v4252_v26  ;;  %v4257_v2 = vpop.eup %3257  ;;  %3289 = vpow2.f32 %v2672_v12 }
 0x161   :  { %4747 = vst [vmem:[#allocation70_spill] sm:$0xff] %v4245_v16  ;;  %v4250_v22 = vpop.f32.mrf.mxu1  ;;  %4751 = vst [vmem:[#allocation74_spill] sm:$0xff] %v4257_v2  ;;  %v4262_v23 = vpop.eup %3259  ;;  %3291 = vpow2.f32 %v2683_v37 }
 0x162   :  { %4748 = vst [vmem:[#allocation71_spill] sm:$0xff] %v4250_v22  ;;  %v4255_v57 = vpop.f32.mrf.mxu0  ;;  %4753 = vst [vmem:[#allocation76_spill] sm:$0xff] %v4262_v23  ;;  %v4267_v22 = vpop.eup %3261  ;;  %3293 = vpow2.f32 %v2669_v47 }
 0x163   :  { %4750 = vst [vmem:[#allocation73_spill] sm:$0xff] %v4255_v57  ;;  %v4260_v16 = vpop.f32.mrf.mxu1  ;;  %4755 = vst [vmem:[#allocation78_spill] sm:$0xff] %v4267_v22  ;;  %v3264_v57 = vpop.eup %3263 }
 0x164   :  { %4752 = vst [vmem:[#allocation75_spill] sm:$0xff] %v4260_v16  ;;  %v4265_v19 = vpop.f32.mrf.mxu0  ;;  %v3266_v29 = vpop.eup %3265  ;;  %v1513_v17 = vadd.f32 1.0, %v3264_v57 }
 0x165   :  { %4754 = vst [vmem:[#allocation77_spill] sm:$0xff] %v4265_v19  ;;  %v4269_v24 = vpop.f32.mrf.mxu1  ;;  %v3268_v23 = vpop.eup %3267  ;;  %v1494_v5 = vadd.f32 1.0, %v3266_v29 }
 0x166   :  { %4756 = vst [vmem:[#allocation79_spill] sm:$0xff] %v4269_v24  ;;  %v4271_v26 = vpop.f32.mrf.mxu0  ;;  %v3270_v19 = vpop.eup %3269  ;;  %3295 = vrcp.f32 %v1513_v17  ;;  %v1514_v22 = vadd.f32 1.0, %v3268_v23 }
 0x167   :  { %4757 = vst [vmem:[#allocation80_spill] sm:$0xff] %v4271_v26  ;;  %v4273_v16 = vpop.f32.mrf.mxu1  ;;  %v3272_v24 = vpop.eup %3271  ;;  %3297 = vrcp.f32 %v1494_v5  ;;  %v1491_v12 = vadd.f32 1.0, %v3270_v19 }
 0x168   :  { %4758 = vst [vmem:[#allocation81_spill] sm:$0xff] %v4273_v16  ;;  %v4275_v2 = vpop.f32.mrf.mxu0  ;;  %v3274_v26 = vpop.eup %3273  ;;  %3299 = vrcp.f32 %v1514_v22  ;;  %v1516_v57 = vadd.f32 1.0, %v3272_v24 }
 0x169   :  { %4759 = vst [vmem:[#allocation82_spill] sm:$0xff] %v4275_v2  ;;  %v4277_v62 = vpop.f32.mrf.mxu1  ;;  %v3276_v16 = vpop.eup %3275  ;;  %3301 = vrcp.f32 %v1491_v12  ;;  %v1500_v47 = vadd.f32 1.0, %v3274_v26 }
 0x16a   :  { %4760 = vst [vmem:[#allocation83_spill] sm:$0xff] %v4277_v62  ;;  %v4279_v42 = vpop.f32.mrf.mxu0  ;;  %v3278_v2 = vpop.eup %3277  ;;  %3303 = vrcp.f32 %v1516_v57  ;;  %v1517_v23 = vadd.f32 1.0, %v3276_v16 }
 0x16b   :  { %4761 = vst [vmem:[#allocation84_spill] sm:$0xff] %v4279_v42  ;;  %v4281_v37 = vpop.f32.mrf.mxu1  ;;  %v3280_v62 = vpop.eup %3279  ;;  %3305 = vrcp.f32 %v1500_v47  ;;  %v1497_v19 = vadd.f32 1.0, %v3278_v2 }
 0x16c   :  { %4762 = vst [vmem:[#allocation85_spill] sm:$0xff] %v4281_v37  ;;  %v4283_v29 = vpop.f32.mrf.mxu0  ;;  %v3282_v42 = vpop.eup %3281  ;;  %3307 = vrcp.f32 %v1517_v23  ;;  %v1519_v22 = vadd.f32 1.0, %v3280_v62 }
 0x16d   :  { %4763 = vst [vmem:[#allocation86_spill] sm:$0xff] %v4283_v29  ;;  %v4285_v17 = vpop.f32.mrf.mxu1  ;;  %v3284_v37 = vpop.eup %3283  ;;  %3309 = vrcp.f32 %v1497_v19  ;;  %v1506_v26 = vadd.f32 1.0, %v3282_v42 }
 0x16e   :  { %4764 = vst [vmem:[#allocation87_spill] sm:$0xff] %v4285_v17  ;;  %v4287_v5 = vpop.f32.mrf.mxu0  ;;  %v3286_v29 = vpop.eup %3285  ;;  %3311 = vrcp.f32 %v1519_v22  ;;  %v1520_v16 = vadd.f32 1.0, %v3284_v37  ;;  %v2685_v22 = vmul.f32 -1.442695, %v4139_v39 }
 0x16f   :  { %4765 = vst [vmem:[#allocation88_spill] sm:$0xff] %v4287_v5  ;;  %v4289_v24 = vpop.f32.mrf.mxu1  ;;  %v3288_v17 = vpop.eup %3287  ;;  %3313 = vrcp.f32 %v1506_v26  ;;  %v1503_v2 = vadd.f32 1.0, %v3286_v29 }
 0x170   :  { %4766 = vst [vmem:[#allocation89_spill] sm:$0xff] %v4289_v24  ;;  %v4291_v12 = vpop.f32.mrf.mxu0  ;;  %v3290_v5 = vpop.eup %3289  ;;  %3315 = vrcp.f32 %v1520_v16  ;;  %v1522_v62 = vadd.f32 1.0, %v3288_v17  ;;  %v2678_v17 = vmul.f32 -1.442695, %v4143_v25 }
 0x171   :  { %4767 = vst [vmem:[#allocation90_spill] sm:$0xff] %v4291_v12  ;;  %v4293_v57 = vpop.f32.mrf.mxu1  ;;  %v3292_v24 = vpop.eup %3291  ;;  %3317 = vrcp.f32 %v1503_v2  ;;  %v1512_v42 = vadd.f32 1.0, %v3290_v5  ;;  %v2686_v5 = vmul.f32 -1.442695, %v4148_v44  ;;  %v2684_v44 = vmul.f32 -1.442695, %v4159_v52 }
 0x172   :  { %4768 = vst [vmem:[#allocation91_spill] sm:$0xff] %v4293_v57  ;;  %v4295_v47 = vpop.f32.mrf.mxu0  ;;  %v3294_v12 = vpop.eup %3293  ;;  %3319 = vrcp.f32 %v1522_v62  ;;  %v1523_v37 = vadd.f32 1.0, %v3292_v24  ;;  %v2675_v24 = vmul.f32 -1.442695, %v4152_v46  ;;  %v1778_v62 = vmul.f32 %v4169_v0, %v3986_v31 }
 0x173   :  { %4769 = vst [vmem:[#allocation92_spill] sm:$0xff] %v4295_v47  ;;  %v4297_v23 = vpop.f32.mrf.mxu1  ;;  %v4304_v29 = vpop.eup %3295  ;;  %3321 = vrcp.f32 %v1512_v42  ;;  %v1509_v26 = vadd.f32 1.0, %v3294_v12  ;;  %v1777_v12 = vmul.f32 %v4146_v41, %v3981_v28  ;;  %v2688_v42 = vmul.f32 -1.442695, %v4156_v48 }
 0x174   :  { %4770 = vst [vmem:[#allocation93_spill] sm:$0xff] %v4297_v23  ;;  %v4299_v19 = vpop.f32.mrf.mxu0  ;;  %4773 = vst [vmem:[#allocation96_spill] sm:$0xff] %v4304_v29  ;;  %v3298_v23 = vpop.eup %3297  ;;  %3323 = vrcp.f32 %v1523_v37  ;;  %v2689_v0 = vmul.f32 -1.442695, %v4163_v8  ;;  %v2681_v48 = vmul.f32 -1.442695, %v4165_v59 }
 0x175   :  { %4771 = vst [vmem:[#allocation94_spill] sm:$0xff] %v4299_v19  ;;  %v4302_v57 = vpop.f32.mrf.mxu1  ;;  %v4308_v19 = vpop.eup %3299  ;;  %3325 = vrcp.f32 %v1509_v26  ;;  %v1782_v31 = vmul.f32 %v3298_v23, %v4086_v63  ;;  %v1780_v63 = vmul.f32 %v4181_v4, %v3992_v36  ;;  %v2691_v23 = vmul.f32 -1.442695, %v4167_v61 }
 0x176   :  { %4772 = vst [vmem:[#allocation95_spill] sm:$0xff] %v4302_v57  ;;  %v3003_v16 = vpop.f32.mrf.mxu0  ;;  %v3302_v47 = vpop.eup %3301  ;;  %3327 = vpow2.f32 %v2685_v22  ;;  %v2692_v36 = vmul.f32 -1.442695, %v4173_v43 }
 0x177   :  { %v785_v2 = vpop.f32.mrf.mxu1  ;;  %v4316_v39 = vpop.eup %3303  ;;  %3329 = vpow2.f32 %v2678_v17  ;;  %v1779_v25 = vmul.f32 %v3302_v47, %v4091_v53 }
 0x178   :  { %v1042_v57 = vpop.f32.mrf.mxu0  ;;  %v3306_v29 = vpop.eup %3305  ;;  %3331 = vpow2.f32 %v2686_v5  ;;  %v1873_v28 = vmul.f32 %v1777_v12, %v785_v2  ;;  %v1878_v5 = vmul.f32 %v3003_v16, %v1782_v31 }
 0x179   :  { %v787_v37 = vpop.f32.mrf.mxu1  ;;  %v4322_v22 = vpop.eup %3307  ;;  %3333 = vpow2.f32 %v2675_v24  ;;  %v1875_v17 = vmul.f32 %v1779_v25, %v1042_v57  ;;  %v2690_v25 = vmul.f32 -1.442695, %v4171_v55 }
 0x17a   :  { %v1874_v26 = vmul.f32 %v1778_v62, %v787_v37  ;;  %v3006_v46 = vpop.f32.mrf.mxu0  ;;  %v1781_v62 = vmul.f32 %v4187_v33, %v3998_v40  ;;  %v3310_v47 = vpop.eup %3309  ;;  %3335 = vpow2.f32 %v2688_v42  ;;  %v1788_v37 = vmul.f32 %v3306_v29, %v4098_v13 }
 0x17b   :  { %v791_v41 = vpop.f32.mrf.mxu1  ;;  %v4330_v12 = vpop.eup %3311  ;;  %3337 = vpow2.f32 %v2684_v44  ;;  %3081 = vmatprep.mubr.f32.mxu1 %v1875_v17  ;;  %v1785_v40 = vmul.f32 %v3310_v47, %v4107_v54  ;;  %v2687_v44 = vmul.f32 -1.442695, %v4177_v60  ;;  %v1784_v54 = vmul.f32 %v4202_v15, %v4010_v49 }
 0x17c   :  { %2113 = vmatprep.mubr.f32.mxu0 %v1874_v26  ;;  %v1052_v53 = vpop.f32.mrf.mxu0  ;;  %v3314_v24 = vpop.eup %3313  ;;  %3339 = vpow2.f32 %v2689_v0  ;;  %v1876_v4 = vmul.f32 %v1780_v63, %v791_v41  ;;  %3082 = vmatmul.mubr.f32.vlgmr.msra.gmra.mxu1 %v1878_v5  ;;  %v1783_v13 = vmul.f32 %v4197_v51, %v4004_v45  ;;  %v2694_v29 = vmul.f32 -1.442695, %v4179_v20 }
 0x17d   :  { %v793_v2 = vpop.f32.mrf.mxu1  ;;  %2114 = vmatmul.mubr.f32.vlgmr.msra.gmra.mxu0 %v1873_v28  ;;  %v4336_v42 = vpop.eup %3315  ;;  %3341 = vpow2.f32 %v2681_v48  ;;  %v1881_v26 = vmul.f32 %v1785_v40, %v1052_v53  ;;  %v1884_v0 = vmul.f32 %v3006_v46, %v1788_v37  ;;  %v2696_v48 = vmul.f32 -1.442695, %v4183_v38 }
 0x17e   :  { %v1877_v57 = vmul.f32 %v1781_v62, %v793_v2  ;;  %v3009_v33 = vpop.f32.mrf.mxu0  ;;  %v3318_v28 = vpop.eup %3317  ;;  %3343 = vpow2.f32 %v2691_v23  ;;  %v1794_v47 = vmul.f32 %v3314_v24, %v4113_v30  ;;  %v2695_v45 = vmul.f32 -1.442695, %v4185_v32 }
 0x17f   :  { %v797_v16 = vpop.f32.mrf.mxu1  ;;  %v4344_v17 = vpop.eup %3319  ;;  %3345 = vpow2.f32 %v2690_v25  ;;  %3084 = vmatprep.mubr.f32.mxu1 %v1881_v26  ;;  %v1791_v49 = vmul.f32 %v3318_v28, %v4121_v10  ;;  %v2693_v23 = vmul.f32 -1.442695, %v4190_v3  ;;  %v1787_v10 = vmul.f32 %v4212_v58, %v4024_v1 }
 0x180   :  { %2118 = vmatprep.mubr.f32.mxu0 %v1877_v57  ;;  %v1062_v31 = vpop.f32.mrf.mxu0  ;;  %v3322_v53 = vpop.eup %3321  ;;  %3347 = vpow2.f32 %v2692_v36  ;;  %v1879_v51 = vmul.f32 %v1783_v13, %v797_v16  ;;  %3085 = vmatmul.mubr.f32.gmra.mxu1 %v1884_v0  ;;  %v1786_v30 = vmul.f32 %v4207_v21, %v4016_v56  ;;  %v1890_v25 = vmul.f32 %v3009_v33, %v1794_v47 }
 0x181   :  { %v799_v41 = vpop.f32.mrf.mxu1  ;;  %2119 = vmatmul.mubr.f32.gmra.mxu0 %v1876_v4  ;;  %v4350_v63 = vpop.eup %3323  ;;  %3349 = vpow2.f32 %v2687_v44  ;;  %v1887_v5 = vmul.f32 %v1791_v49, %v1062_v31  ;;  %v1800_v16 = vmul.f32 %v3322_v53, %v4129_v35  ;;  %v1790_v26 = vmul.f32 %v4237_v11, %v4035_v9 }
 0x182   :  { %v1880_v62 = vmul.f32 %v1784_v54, %v799_v41  ;;  %v3012_v15 = vpop.f32.mrf.mxu0  ;;  %v3326_v2 = vpop.eup %3325  ;;  %3351 = vpow2.f32 %v2694_v29  ;;  %v1792_v53 = vmul.f32 %v4242_v7, %v4043_v14  ;;  %v4774_v14 = vld [vmem:[#allocation30_spill] sm:$0xff] }
 0x183   :  { %v803_v46 = vpop.f32.mrf.mxu1  ;;  %v3328_v24 = vpop.eup %3327  ;;  %3353 = vpow2.f32 %v2696_v48  ;;  %3087 = vmatprep.mubr.f32.mxu1 %v1887_v5  ;;  %v1797_v36 = vmul.f32 %v3326_v2, %v4136_v27  ;;  %v1789_v27 = vmul.f32 %v4232_v50, %v4030_v6  ;;  %v1896_v35 = vmul.f32 %v3012_v15, %v1800_v16  ;;  %v4775_v7 = vld [vmem:[#allocation74_spill] sm:$0xff] }
 0x184   :  { %2123 = vmatprep.mubr.f32.mxu0 %v1880_v62  ;;  %v1072_v40 = vpop.f32.mrf.mxu0  ;;  %v3330_v4 = vpop.eup %3329  ;;  %v1525_v44 = vadd.f32 1.0, %v3328_v24  ;;  %3355 = vpow2.f32 %v2695_v45  ;;  %v1882_v1 = vmul.f32 %v1786_v30, %v803_v46  ;;  %3088 = vmatmul.mubr.f32.gmra.mxu1 %v1890_v25  ;;  %v1793_v50 = vmul.f32 %v4247_v34, %v4050_v18  ;;  %v4776_v24 = vld [vmem:[#allocation28_spill] sm:$0xff] }
 0x185   :  { %v805_v57 = vpop.f32.mrf.mxu1  ;;  %2124 = vmatmul.mubr.f32.gmra.mxu0 %v1879_v51  ;;  %v3332_v56 = vpop.eup %3331  ;;  %v1518_v21 = vadd.f32 1.0, %v3330_v4  ;;  %3357 = vpow2.f32 %v2693_v23  ;;  %v1893_v33 = vmul.f32 %v1797_v36, %v1072_v40 }
 0x186   :  { %v1883_v37 = vmul.f32 %v1787_v10, %v805_v57  ;;  %v3334_v54 = vpop.eup %3333  ;;  %3359 = vrcp.f32 %v1525_v44  ;;  %v1526_v31 = vadd.f32 1.0, %v3332_v56  ;;  %v4363_v28 = vpop.f32.mrf.mxu0  ;;  %v1796_v57 = vmul.f32 %v4775_v7, %v4774_v14  ;;  %v4786_v14 = vld [vmem:[#allocation37_spill] sm:$0xff] }
 0x187   :  { %v809_v58 = vpop.f32.mrf.mxu1  ;;  %v3336_v29 = vpop.eup %3335  ;;  %3361 = vrcp.f32 %v1518_v21  ;;  %v1515_v0 = vadd.f32 1.0, %v3334_v54  ;;  %3090 = vmatprep.mubr.f32.mxu1 %v1893_v33  ;;  %v1802_v7 = vmul.f32 %v4308_v19, %v4786_v14 }
 0x188   :  { %2128 = vmatprep.mubr.f32.mxu0 %v1883_v37  ;;  %v3338_v48 = vpop.eup %3337  ;;  %3363 = vrcp.f32 %v1526_v31  ;;  %v1528_v62 = vadd.f32 1.0, %v3336_v29  ;;  %v1885_v9 = vmul.f32 %v1789_v27, %v809_v58  ;;  %3091 = vmatmul.mubr.f32.gmra.mxu1 %v1896_v35  ;;  %v4369_v45 = vpop.f32.mrf.mxu0  ;;  %v4777_v37 = vld [vmem:[#allocation72_spill] sm:$0xff]  ;;  %v4778_v35 = vld [vmem:[#allocation34_spill] sm:$0xff] }
 0x189   :  { %v811_v13 = vpop.f32.mrf.mxu1  ;;  %2129 = vmatmul.mubr.f32.gmra.mxu0 %v1882_v1  ;;  %v3340_v49 = vpop.eup %3339  ;;  %3365 = vrcp.f32 %v1515_v0  ;;  %v1524_v6 = vadd.f32 1.0, %v3338_v48  ;;  %v1795_v36 = vmul.f32 %v4777_v37, %v4776_v24  ;;  %v4781_v48 = vld [vmem:[#allocation76_spill] sm:$0xff] }
 0x18a   :  { %v1886_v41 = vmul.f32 %v1790_v26, %v811_v13  ;;  %v3342_v15 = vpop.eup %3341  ;;  %3367 = vrcp.f32 %v1528_v62  ;;  %v1529_v47 = vadd.f32 1.0, %v3340_v49  ;;  %v4375_v16 = vpop.f32.mrf.mxu0  ;;  %v4779_v13 = vld [vmem:[#allocation78_spill] sm:$0xff]  ;;  %v4788_v24 = vld [vmem:[#allocation96_spill] sm:$0xff] }
 0x18b   :  { %v815_v11 = vpop.f32.mrf.mxu1  ;;  %v3344_v46 = vpop.eup %3343  ;;  %3369 = vrcp.f32 %v1524_v6  ;;  %v1521_v23 = vadd.f32 1.0, %v3342_v15  ;;  %v1799_v29 = vmul.f32 %v4779_v13, %v4778_v35  ;;  %v4793_v35 = vld [vmem:[#allocation65_spill] sm:$0xff] }
 0x18c   :  { %2133 = vmatprep.mubr.f32.mxu0 %v1886_v41  ;;  %v3346_v10 = vpop.eup %3345  ;;  %3371 = vrcp.f32 %v1529_v47  ;;  %v1531_v2 = vadd.f32 1.0, %v3344_v46  ;;  %v1888_v30 = vmul.f32 %v1792_v53, %v815_v11  ;;  %v4780_v41 = vld [vmem:[#allocation32_spill] sm:$0xff]  ;;  %v4782_v11 = vld [vmem:[#allocation57_spill] sm:$0xff]  ;;  %v4382_v6 = vpop.f32.mrf.mxu0  ;;  %v4783_v47 = vld [vmem:[#allocation58_spill] sm:$0xff]  ;;  %v2701_v13 = vmul.f32 -1.442695, %v4793_v35 }
 0x18d   :  { %v817_v51 = vpop.f32.mrf.mxu1  ;;  %2134 = vmatmul.mubr.f32.gmra.mxu0 %v1885_v9  ;;  %v3348_v18 = vpop.eup %3347  ;;  %3373 = vrcp.f32 %v1521_v23  ;;  %v1530_v34 = vadd.f32 1.0, %v3346_v10  ;;  %v1798_v62 = vmul.f32 %v4781_v48, %v4780_v41  ;;  %v2697_v49 = vmul.f32 -1.442695, %v4782_v11  ;;  %v4794_v48 = vld [vmem:[#allocation67_spill] sm:$0xff] }
 0x18e   :  { %v1889_v5 = vmul.f32 %v1793_v50, %v817_v51  ;;  %v3350_v40 = vpop.eup %3349  ;;  %3375 = vrcp.f32 %v1531_v2  ;;  %v1532_v4 = vadd.f32 1.0, %v3348_v18  ;;  %v2702_v51 = vmul.f32 -1.442695, %v4783_v47  ;;  %v4785_v18 = vld [vmem:[#allocation60_spill] sm:$0xff] }
 0x18f   :  { %v821_v25 = vpop.f32.mrf.mxu1  ;;  %v3352_v1 = vpop.eup %3351  ;;  %3377 = vrcp.f32 %v1530_v34  ;;  %v1527_v58 = vadd.f32 1.0, %v3350_v40  ;;  %v2699_v34 = vmul.f32 -1.442695, %v4785_v18  ;;  %v4787_v40 = vld [vmem:[#allocation36_spill] sm:$0xff] }
 0x190   :  { %2138 = vmatprep.mubr.f32.mxu0 %v1889_v5  ;;  %v3354_v21 = vpop.eup %3353  ;;  %3379 = vrcp.f32 %v1532_v4  ;;  %v1534_v33 = vadd.f32 1.0, %v3352_v1  ;;  %v1891_v26 = vmul.f32 %v1795_v36, %v821_v25  ;;  %v4784_v5 = vld [vmem:[#allocation59_spill] sm:$0xff]  ;;  %v1801_v37 = vmul.f32 %v4788_v24, %v4787_v40  ;;  %v4789_v36 = vld [vmem:[#allocation61_spill] sm:$0xff]  ;;  %v4799_v24 = vld [vmem:[#allocation70_spill] sm:$0xff] }
 0x191   :  { %v823_v44 = vpop.f32.mrf.mxu1  ;;  %2139 = vmatmul.mubr.f32.gmra.mxu0 %v1888_v30  ;;  %v3356_v27 = vpop.eup %3355  ;;  %3381 = vrcp.f32 %v1527_v58  ;;  %v1536_v31 = vadd.f32 1.0, %v3354_v21  ;;  %v2698_v10 = vmul.f32 -1.442695, %v4784_v5  ;;  %v2700_v4 = vmul.f32 -1.442695, %v4789_v36 }
 0x192   :  { %v1892_v56 = vmul.f32 %v1796_v57, %v823_v44  ;;  %v3358_v0 = vpop.eup %3357  ;;  %3383 = vrcp.f32 %v1534_v33  ;;  %v1535_v9 = vadd.f32 1.0, %v3356_v27  ;;  %v4396_v44 = vpop.f32.mrf.mxu0  ;;  %v4791_v33 = vld [vmem:[#allocation53_spill] sm:$0xff]  ;;  %v4792_v27 = vld [vmem:[#allocation50_spill] sm:$0xff] }
 0x193   :  { %v827_v54 = vpop.f32.mrf.mxu1  ;;  %v4384_v15 = vpop.eup %3359  ;;  %3385 = vrcp.f32 %v1536_v31  ;;  %v1533_v53 = vadd.f32 1.0, %v3358_v0 }
 0x194   :  { %2143 = vmatprep.mubr.f32.mxu0 %v1892_v56  ;;  %v3362_v23 = vpop.eup %3361  ;;  %3387 = vrcp.f32 %v1535_v9  ;;  %v1894_v2 = vmul.f32 %v1798_v62, %v827_v54  ;;  %v4790_v56 = vld [vmem:[#allocation63_spill] sm:$0xff]  ;;  %v2705_v62 = vmul.f32 -1.442695, %v4794_v48 }
 0x195   :  { %v829_v50 = vpop.f32.mrf.mxu1  ;;  %2144 = vmatmul.mubr.f32.gmra.mxu0 %v1891_v26  ;;  %v4388_v25 = vpop.eup %3363  ;;  %3389 = vrcp.f32 %v1533_v53  ;;  %v2708_v21 = vmul.f32 -1.442695, %v4790_v56  ;;  %v1806_v31 = vmul.f32 %v3362_v23, %v4792_v27  ;;  %v4797_v23 = vld [vmem:[#allocation68_spill] sm:$0xff] }
 0x196   :  { %v1895_v46 = vmul.f32 %v1799_v29, %v829_v50  ;;  %v3366_v57 = vpop.eup %3365  ;;  %3391 = vpow2.f32 %v2697_v49  ;;  %v4795_v49 = vld [vmem:[#allocation39_spill] sm:$0xff] }
 0x197   :  { %v833_v30 = vpop.f32.mrf.mxu1  ;;  %v4398_v58 = vpop.eup %3367  ;;  %3393 = vpow2.f32 %v2702_v51  ;;  %v1803_v26 = vmul.f32 %v3366_v57, %v4791_v33  ;;  %v1805_v50 = vmul.f32 %v4322_v22, %v4795_v49  ;;  %v4796_v51 = vld [vmem:[#allocation38_spill] sm:$0xff]  ;;  %v4800_v33 = vld [vmem:[#allocation71_spill] sm:$0xff] }
 0x198   :  { %2148 = vmatprep.mubr.f32.mxu0 %v1895_v46  ;;  %v3370_v19 = vpop.eup %3369  ;;  %3395 = vpow2.f32 %v2698_v10  ;;  %v1897_v29 = vmul.f32 %v1801_v37, %v833_v30  ;;  %v1804_v46 = vmul.f32 %v4316_v39, %v4796_v51  ;;  %v2703_v10 = vmul.f32 -1.442695, %v4797_v23  ;;  %v1102_v30 = vpop.f32.mrf.mxu0  ;;  %v4805_v51 = vld [vmem:[#allocation77_spill] sm:$0xff] }
 0x199   :  { %v835_v1 = vpop.f32.mrf.mxu1  ;;  %2149 = vmatmul.mubr.f32.gmra.mxu0 %v1894_v2  ;;  %v4404_v41 = vpop.eup %3371  ;;  %3397 = vpow2.f32 %v2699_v34  ;;  %v1899_v9 = vmul.f32 %v1803_v26, %v4369_v45  ;;  %v1902_v2 = vmul.f32 %v4363_v28, %v1806_v31  ;;  %v4798_v45 = vld [vmem:[#allocation69_spill] sm:$0xff]  ;;  %v1812_v39 = vmul.f32 %v3370_v19, %v4159_v52 }
 0x19a   :  { %v1898_v54 = vmul.f32 %v1802_v7, %v835_v1  ;;  %v3374_v53 = vpop.eup %3373  ;;  %3399 = vpow2.f32 %v2700_v4  ;;  %v2714_v7 = vmul.f32 -1.442695, %v4798_v45  ;;  %v2704_v37 = vmul.f32 -1.442695, %v4799_v24  ;;  %v4802_v31 = vld [vmem:[#allocation41_spill] sm:$0xff] }
 0x19b   :  { %v839_v0 = vpop.f32.mrf.mxu1  ;;  %v4414_v34 = vpop.eup %3375  ;;  %3401 = vpow2.f32 %v2708_v21  ;;  %3093 = vmatprep.mubr.f32.mxu1 %v1899_v9  ;;  %v1809_v22 = vmul.f32 %v3374_v53, %v4165_v59  ;;  %v2711_v21 = vmul.f32 -1.442695, %v4800_v33  ;;  %v1807_v52 = vmul.f32 %v4330_v12, %v4802_v31  ;;  %v4803_v19 = vld [vmem:[#allocation73_spill] sm:$0xff] }
 0x19c   :  { %2153 = vmatprep.mubr.f32.mxu0 %v1898_v54  ;;  %v3378_v40 = vpop.eup %3377  ;;  %3403 = vpow2.f32 %v2701_v13  ;;  %3094 = vmatmul.mubr.f32.gmra.mxu1 %v1902_v2  ;;  %v1900_v28 = vmul.f32 %v1804_v46, %v839_v0  ;;  %v4801_v54 = vld [vmem:[#allocation42_spill] sm:$0xff]  ;;  %v2706_v13 = vmul.f32 -1.442695, %v4803_v19  ;;  %v3024_v0 = vpop.f32.mrf.mxu0  ;;  %v2707_v46 = vmul.f32 -1.442695, %v4805_v51 }
 0x19d   :  { %v841_v14 = vpop.f32.mrf.mxu1  ;;  %2154 = vmatmul.mubr.f32.gmra.mxu0 %v1897_v29  ;;  %v4420_v1 = vpop.eup %3379  ;;  %3405 = vpow2.f32 %v2705_v62  ;;  %v1905_v26 = vmul.f32 %v1809_v22, %v4382_v6  ;;  %v1808_v59 = vmul.f32 %v4336_v42, %v4801_v54  ;;  %v1908_v29 = vmul.f32 %v4375_v16, %v1812_v39  ;;  %v4804_v6 = vld [vmem:[#allocation75_spill] sm:$0xff] }
 0x19e   :  { %v1901_v57 = vmul.f32 %v1805_v50, %v841_v14  ;;  %v3382_v27 = vpop.eup %3381  ;;  %3407 = vpow2.f32 %v2703_v10  ;;  %v2720_v49 = vmul.f32 -1.442695, %v4804_v6  ;;  %v1818_v12 = vmul.f32 %v3378_v40, %v4171_v55  ;;  %v4806_v14 = vld [vmem:[#allocation79_spill] sm:$0xff] }
 0x19f   :  { %v845_v4 = vpop.f32.mrf.mxu1  ;;  %v4430_v62 = vpop.eup %3383  ;;  %3409 = vpow2.f32 %v2714_v7  ;;  %3096 = vmatprep.mubr.f32.mxu1 %v1905_v26  ;;  %v1815_v42 = vmul.f32 %v3382_v27, %v4177_v60  ;;  %v2717_v7 = vmul.f32 -1.442695, %v4806_v14 }
 0x1a0   :  { %2158 = vmatprep.mubr.f32.mxu0 %v1901_v57  ;;  %v3386_v53 = vpop.eup %3385  ;;  %3411 = vpow2.f32 %v2704_v37  ;;  %3097 = vmatmul.mubr.f32.gmra.mxu1 %v1908_v29  ;;  %v1903_v16 = vmul.f32 %v1807_v52, %v845_v4  ;;  %v4807_v57 = vld [vmem:[#allocation46_spill] sm:$0xff]  ;;  %v1914_v40 = vmul.f32 %v4396_v44, %v1818_v12  ;;  %v1112_v37 = vpop.f32.mrf.mxu0 }
 0x1a1   :  { %v847_v9 = vpop.f32.mrf.mxu1  ;;  %2159 = vmatmul.mubr.f32.gmra.mxu0 %v1900_v28  ;;  %v4436_v2 = vpop.eup %3387  ;;  %3413 = vpow2.f32 %v2711_v21  ;;  %v1911_v22 = vmul.f32 %v1815_v42, %v1102_v30  ;;  %v1811_v60 = vmul.f32 %v4350_v63, %v4807_v57  ;;  %v4808_v28 = vld [vmem:[#allocation44_spill] sm:$0xff] }
 0x1a2   :  { %v1904_v50 = vmul.f32 %v1808_v59, %v847_v9  ;;  %v3390_v39 = vpop.eup %3389  ;;  %v1810_v55 = vmul.f32 %v4344_v17, %v4808_v28  ;;  %3415 = vpow2.f32 %v2706_v13  ;;  %v1824_v59 = vmul.f32 %v3386_v53, %v4183_v38  ;;  %v4809_v13 = vld [vmem:[#allocation51_spill] sm:$0xff] }
 0x1a3   :  { %v851_v10 = vpop.f32.mrf.mxu1  ;;  %v3392_v26 = vpop.eup %3391  ;;  %3417 = vpow2.f32 %v2720_v49  ;;  %3099 = vmatprep.mubr.f32.mxu1 %v1911_v22  ;;  %v1821_v21 = vmul.f32 %v3390_v39, %v4190_v3  ;;  %v1814_v29 = vmul.f32 %v4388_v25, %v4809_v13  ;;  %v4810_v49 = vld [vmem:[#allocation48_spill] sm:$0xff]  ;;  %v4811_v39 = vld [vmem:[#allocation54_spill] sm:$0xff] }
 0x1a4   :  { %2163 = vmatprep.mubr.f32.mxu0 %v1904_v50  ;;  %v3394_v54 = vpop.eup %3393  ;;  %v1537_v63 = vadd.f32 1.0, %v3392_v26  ;;  %3419 = vpow2.f32 %v2707_v46  ;;  %3100 = vmatmul.mubr.f32.gmra.mxu1 %v1914_v40  ;;  %v1906_v27 = vmul.f32 %v1810_v55, %v851_v10  ;;  %v1813_v3 = vmul.f32 %v4384_v15, %v4810_v49  ;;  %v4450_v50 = vpop.f32.mrf.mxu0 }
 0x1a5   :  { %v853_v4 = vpop.f32.mrf.mxu1  ;;  %2164 = vmatmul.mubr.f32.gmra.mxu0 %v1903_v16  ;;  %v3396_v31 = vpop.eup %3395  ;;  %v1542_v52 = vadd.f32 1.0, %v3394_v54  ;;  %3421 = vpow2.f32 %v2717_v7  ;;  %v1917_v44 = vmul.f32 %v1821_v21, %v1112_v37  ;;  %v1920_v38 = vmul.f32 %v3024_v0, %v1824_v59 }
 0x1a6   :  { %v1907_v30 = vmul.f32 %v1811_v60, %v853_v4  ;;  %v3398_v9 = vpop.eup %3397  ;;  %3423 = vrcp.f32 %v1537_v63  ;;  %v1538_v42 = vadd.f32 1.0, %v3396_v31  ;;  %v1817_v0 = vmul.f32 %v4404_v41, %v4163_v8  ;;  %v4456_v40 = vpop.f32.mrf.mxu0 }
 0x1a7   :  { %v857_v17 = vpop.f32.mrf.mxu1  ;;  %v3400_v12 = vpop.eup %3399  ;;  %3425 = vrcp.f32 %v1542_v52  ;;  %v1539_v46 = vadd.f32 1.0, %v3398_v9  ;;  %3102 = vmatprep.mubr.f32.mxu1 %v1917_v44  ;;  %v1816_v28 = vmul.f32 %v4398_v58, %v4811_v39  ;;  %v1820_v58 = vmul.f32 %v4420_v1, %v4173_v43 }
 0x1a8   :  { %2168 = vmatprep.mubr.f32.mxu0 %v1907_v30  ;;  %v3402_v10 = vpop.eup %3401  ;;  %3427 = vrcp.f32 %v1538_v42  ;;  %v1540_v7 = vadd.f32 1.0, %v3400_v12  ;;  %3103 = vmatmul.mubr.f32.gmra.mxu1 %v1920_v38  ;;  %v1909_v25 = vmul.f32 %v1813_v3, %v857_v17  ;;  %v1819_v17 = vmul.f32 %v4414_v34, %v4167_v61  ;;  %v4462_v52 = vpop.f32.mrf.mxu0 }
 0x1a9   :  { %v859_v53 = vpop.f32.mrf.mxu1  ;;  %2169 = vmatmul.mubr.f32.gmra.mxu0 %v1906_v27  ;;  %v3404_v57 = vpop.eup %3403  ;;  %3429 = vrcp.f32 %v1539_v46  ;;  %v1548_v15 = vadd.f32 1.0, %v3402_v10  ;;  %v1823_v61 = vmul.f32 %v4436_v2, %v4185_v32  ;;  %v4812_v46 = vld [vmem:[#allocation80_spill] sm:$0xff]  ;;  %v4814_v32 = vld [vmem:[#allocation82_spill] sm:$0xff] }
 0x1aa   :  { %v1910_v16 = vmul.f32 %v1814_v29, %v859_v53  ;;  %v3406_v60 = vpop.eup %3405  ;;  %3431 = vrcp.f32 %v1540_v7  ;;  %v1541_v55 = vadd.f32 1.0, %v3404_v57  ;;  %v1822_v53 = vmul.f32 %v4430_v62, %v4179_v20  ;;  %v4469_v10 = vpop.f32.mrf.mxu0  ;;  %v4813_v57 = vld [vmem:[#allocation81_spill] sm:$0xff] }
 0x1ab   :  { %v863_v22 = vpop.f32.mrf.mxu1  ;;  %v3408_v4 = vpop.eup %3407  ;;  %3433 = vrcp.f32 %v1548_v15  ;;  %v1545_v26 = vadd.f32 1.0, %v3406_v60  ;;  %v2726_v15 = vmul.f32 -1.442695, %v4813_v57  ;;  %v2710_v2 = vmul.f32 -1.442695, %v4814_v32 }
 0x1ac   :  { %2173 = vmatprep.mubr.f32.mxu0 %v1910_v16  ;;  %v3410_v30 = vpop.eup %3409  ;;  %3435 = vrcp.f32 %v1541_v55  ;;  %v1543_v54 = vadd.f32 1.0, %v3408_v4  ;;  %v1912_v59 = vmul.f32 %v1816_v28, %v863_v22  ;;  %v2709_v16 = vmul.f32 -1.442695, %v4812_v46  ;;  %v4815_v28 = vld [vmem:[#allocation83_spill] sm:$0xff] }
 0x1ad   :  { %v865_v37 = vpop.f32.mrf.mxu1  ;;  %2174 = vmatmul.mubr.f32.gmra.mxu0 %v1909_v25  ;;  %v3412_v8 = vpop.eup %3411  ;;  %3437 = vrcp.f32 %v1545_v26  ;;  %v1554_v41 = vadd.f32 1.0, %v3410_v30  ;;  %v2723_v55 = vmul.f32 -1.442695, %v4815_v28  ;;  %v4816_v26 = vld [vmem:[#allocation84_spill] sm:$0xff] }
 0x1ae   :  { %v1913_v21 = vmul.f32 %v1817_v0, %v865_v37  ;;  %v3414_v27 = vpop.eup %3413  ;;  %3439 = vrcp.f32 %v1543_v54  ;;  %v1544_v31 = vadd.f32 1.0, %v3412_v8  ;;  %v4476_v30 = vpop.f32.mrf.mxu0 }
 0x1af   :  { %v869_v63 = vpop.f32.mrf.mxu1  ;;  %v3416_v13 = vpop.eup %3415  ;;  %3441 = vrcp.f32 %v1554_v41  ;;  %v1551_v29 = vadd.f32 1.0, %v3414_v27  ;;  %v4817_v41 = vld [vmem:[#allocation85_spill] sm:$0xff] }
 0x1b0   :  { %2178 = vmatprep.mubr.f32.mxu0 %v1913_v21  ;;  %v3418_v49 = vpop.eup %3417  ;;  %3443 = vrcp.f32 %v1544_v31  ;;  %v1546_v3 = vadd.f32 1.0, %v3416_v13  ;;  %v1915_v42 = vmul.f32 %v1819_v17, %v869_v63  ;;  %v2712_v21 = vmul.f32 -1.442695, %v4816_v26 }
 0x1b1   :  { %v871_v44 = vpop.f32.mrf.mxu1  ;;  %2179 = vmatmul.mubr.f32.gmra.mxu0 %v1912_v59  ;;  %v3420_v43 = vpop.eup %3419  ;;  %3445 = vrcp.f32 %v1551_v29  ;;  %v1560_v1 = vadd.f32 1.0, %v3418_v49 }
 0x1b2   :  { %v1916_v9 = vmul.f32 %v1820_v58, %v871_v44  ;;  %v3422_v34 = vpop.eup %3421  ;;  %3447 = vrcp.f32 %v1546_v3  ;;  %v1547_v12 = vadd.f32 1.0, %v3420_v43  ;;  %v2732_v58 = vmul.f32 -1.442695, %v4817_v41 }
 0x1b3   :  { %v875_v38 = vpop.f32.mrf.mxu1  ;;  %v3424_v25 = vpop.eup %3423  ;;  %3449 = vrcp.f32 %v1560_v1  ;;  %v1557_v22 = vadd.f32 1.0, %v3422_v34 }
 0x1b4   :  { %2183 = vmatprep.mubr.f32.mxu0 %v1916_v9  ;;  %v3426_v60 = vpop.eup %3425  ;;  %3451 = vrcp.f32 %v1547_v12  ;;  %v1918_v39 = vmul.f32 %v1822_v53, %v875_v38  ;;  %v1825_v63 = vmul.f32 %v3424_v25, %v4782_v11  ;;  %v4819_v9 = vld [vmem:[#allocation87_spill] sm:$0xff]  ;;  %v4820_v38 = vld [vmem:[#allocation88_spill] sm:$0xff]  ;;  %v1142_v1 = vpop.f32.mrf.mxu0  ;;  %v4822_v25 = vld [vmem:[#allocation90_spill] sm:$0xff] }
 0x1b5   :  { %v877_v7 = vpop.f32.mrf.mxu1  ;;  %2184 = vmatmul.mubr.f32.gmra.mxu0 %v1915_v42  ;;  %v3428_v62 = vpop.eup %3427  ;;  %3453 = vrcp.f32 %v1557_v22  ;;  %v1830_v17 = vmul.f32 %v3426_v60, %v4783_v47  ;;  %v2729_v49 = vmul.f32 -1.442695, %v4819_v9  ;;  %v2715_v43 = vmul.f32 -1.442695, %v4820_v38  ;;  %v4823_v60 = vld [vmem:[#allocation91_spill] sm:$0xff] }
 0x1b6   :  { %v1919_v0 = vmul.f32 %v1823_v61, %v877_v7  ;;  %v3430_v37 = vpop.eup %3429  ;;  %v1826_v4 = vmul.f32 %v3428_v62, %v4784_v5  ;;  %3455 = vpow2.f32 %v2709_v16  ;;  %v4818_v5 = vld [vmem:[#allocation86_spill] sm:$0xff]  ;;  %v4821_v16 = vld [vmem:[#allocation89_spill] sm:$0xff]  ;;  %v2716_v22 = vmul.f32 -1.442695, %v4822_v25  ;;  %v4824_v62 = vld [vmem:[#allocation92_spill] sm:$0xff] }
 0x1b7   :  { %v881_v20 = vpop.f32.mrf.mxu1  ;;  %v3432_v59 = vpop.eup %3431  ;;  %v1827_v8 = vmul.f32 %v3430_v37, %v4785_v18  ;;  %3457 = vpow2.f32 %v2726_v15  ;;  %v2713_v31 = vmul.f32 -1.442695, %v4818_v5  ;;  %v1926_v47 = vmul.f32 %v4450_v50, %v1830_v17 }
 0x1b8   :  { %2188 = vmatprep.mubr.f32.mxu0 %v1919_v0  ;;  %v3434_v27 = vpop.eup %3433  ;;  %3459 = vpow2.f32 %v2710_v2  ;;  %v1921_v11 = vmul.f32 %v1825_v63, %v881_v20  ;;  %v1828_v53 = vmul.f32 %v3432_v59, %v4789_v36  ;;  %v2735_v36 = vmul.f32 -1.442695, %v4823_v60  ;;  %v3036_v37 = vpop.f32.mrf.mxu0  ;;  %v4825_v63 = vld [vmem:[#allocation93_spill] sm:$0xff] }
 0x1b9   :  { %v883_v54 = vpop.f32.mrf.mxu1  ;;  %2189 = vmatmul.mubr.f32.gmra.mxu0 %v1918_v39  ;;  %v3436_v29 = vpop.eup %3435  ;;  %3461 = vpow2.f32 %v2723_v55  ;;  %v1923_v3 = vmul.f32 %v1827_v8, %v4456_v40  ;;  %v2738_v40 = vmul.f32 -1.442695, %v4821_v16  ;;  %v2718_v55 = vmul.f32 -1.442695, %v4824_v62 }
 0x1ba   :  { %v1922_v44 = vmul.f32 %v1826_v4, %v883_v54  ;;  %v3438_v42 = vpop.eup %3437  ;;  %v1829_v18 = vmul.f32 %v3436_v29, %v4793_v35  ;;  %3463 = vpow2.f32 %v2712_v21  ;;  %v1836_v35 = vmul.f32 %v3434_v27, %v4790_v56 }
 0x1bb   :  { %v887_v13 = vpop.f32.mrf.mxu1  ;;  %v3440_v34 = vpop.eup %3439  ;;  %v1833_v12 = vmul.f32 %v3438_v42, %v4794_v48  ;;  %3465 = vpow2.f32 %v2732_v58  ;;  %3105 = vmatprep.mubr.f32.mxu1 %v1923_v3  ;;  %v4826_v58 = vld [vmem:[#allocation94_spill] sm:$0xff] }
 0x1bc   :  { %2193 = vmatprep.mubr.f32.mxu0 %v1922_v44  ;;  %v3442_v7 = vpop.eup %3441  ;;  %3467 = vpow2.f32 %v2713_v31  ;;  %3106 = vmatmul.mubr.f32.gmra.mxu1 %v1926_v47  ;;  %v1924_v2 = vmul.f32 %v1828_v53, %v887_v13  ;;  %v1932_v56 = vmul.f32 %v4462_v52, %v1836_v35  ;;  %v1831_v54 = vmul.f32 %v3440_v34, %v4797_v23  ;;  %v4827_v44 = vld [vmem:[#allocation95_spill] sm:$0xff] }
 0x1bd   :  { %v889_v61 = vpop.f32.mrf.mxu1  ;;  %2194 = vmatmul.mubr.f32.gmra.mxu0 %v1921_v11  ;;  %v3444_v0 = vpop.eup %3443  ;;  %3469 = vpow2.f32 %v2729_v49  ;;  %v1929_v48 = vmul.f32 %v1833_v12, %v4469_v10  ;;  %v2744_v10 = vmul.f32 -1.442695, %v4825_v63  ;;  %v2719_v27 = vmul.f32 -1.442695, %v4826_v58 }
 0x1be   :  { %v1925_v50 = vmul.f32 %v1829_v18, %v889_v61  ;;  %v3446_v39 = vpop.eup %3445  ;;  %v1832_v20 = vmul.f32 %v3444_v0, %v4799_v24  ;;  %3471 = vpow2.f32 %v2715_v43  ;;  %v1842_v24 = vmul.f32 %v3442_v7, %v4798_v45  ;;  %v1152_v11 = vpop.f32.mrf.mxu0 }
 0x1bf   :  { %v893_v15 = vpop.f32.mrf.mxu1  ;;  %v3448_v21 = vpop.eup %3447  ;;  %v1839_v59 = vmul.f32 %v3446_v39, %v4800_v33  ;;  %3473 = vpow2.f32 %v2738_v40  ;;  %3108 = vmatprep.mubr.f32.mxu1 %v1929_v48  ;;  %v2741_v23 = vmul.f32 -1.442695, %v4827_v44 }
 0x1c0   :  { %2198 = vmatprep.mubr.f32.mxu0 %v1925_v50  ;;  %v3450_v8 = vpop.eup %3449  ;;  %3475 = vpow2.f32 %v2716_v22  ;;  %3109 = vmatmul.mubr.f32.gmra.mxu1 %v1932_v56  ;;  %v1927_v33 = vmul.f32 %v1831_v54, %v893_v15  ;;  %v1938_v3 = vmul.f32 %v4476_v30, %v1842_v24  ;;  %v1834_v18 = vmul.f32 %v3448_v21, %v4803_v19  ;;  %v4511_v35 = vpop.f32.mrf.mxu0 }
 0x1c1   :  { %v895_v4 = vpop.f32.mrf.mxu1  ;;  %2199 = vmatmul.mubr.f32.gmra.mxu0 %v1924_v2  ;;  %v3452_v31 = vpop.eup %3451  ;;  %3477 = vpow2.f32 %v2735_v36  ;;  %v1935_v13 = vmul.f32 %v1839_v59, %v1142_v1  ;;  %v1848_v1 = vmul.f32 %v3450_v8, %v4804_v6 }
 0x1c2   :  { %v1928_v52 = vmul.f32 %v1832_v20, %v895_v4  ;;  %v3454_v29 = vpop.eup %3453  ;;  %v1835_v49 = vmul.f32 %v3452_v31, %v4805_v51  ;;  %3479 = vpow2.f32 %v2718_v55  ;;  %v4517_v55 = vpop.f32.mrf.mxu0 }
 0x1c3   :  { %v899_v17 = vpop.f32.mrf.mxu1  ;;  %v3456_v42 = vpop.eup %3455  ;;  %v1845_v43 = vmul.f32 %v3454_v29, %v4806_v14  ;;  %3481 = vpow2.f32 %v2744_v10  ;;  %3111 = vmatprep.mubr.f32.mxu1 %v1935_v13  ;;  %v1944_v7 = vmul.f32 %v3036_v37, %v1848_v1 }
 0x1c4   :  { %2203 = vmatprep.mubr.f32.mxu0 %v1928_v52  ;;  %v3458_v47 = vpop.eup %3457  ;;  %v1549_v61 = vadd.f32 1.0, %v3456_v42  ;;  %3483 = vpow2.f32 %v2719_v27  ;;  %3112 = vmatmul.mubr.f32.gmra.mxu1 %v1938_v3  ;;  %v1930_v40 = vmul.f32 %v1834_v18, %v899_v17  ;;  %v4523_v52 = vpop.f32.mrf.mxu0 }
 0x1c5   :  { %v901_v45 = vpop.f32.mrf.mxu1  ;;  %2204 = vmatmul.mubr.f32.gmra.mxu0 %v1927_v33  ;;  %v3460_v30 = vpop.eup %3459  ;;  %v1566_v53 = vadd.f32 1.0, %v3458_v47  ;;  %3485 = vpow2.f32 %v2741_v23  ;;  %v1941_v12 = vmul.f32 %v1845_v43, %v1152_v11 }
 0x1c6   :  { %v1931_v51 = vmul.f32 %v1835_v49, %v901_v45  ;;  %v3462_v19 = vpop.eup %3461  ;;  %3487 = vrcp.f32 %v1549_v61  ;;  %v1550_v14 = vadd.f32 1.0, %v3460_v30  ;;  %v4828_v45 = vld [vmem:[#allocation31_spill] sm:$0xff]  ;;  %v1172_v43 = vpop.f32.mrf.mxu0  ;;  %v4829_v61 = vld [vmem:[#allocation26_spill] sm:$0xff] }
 0x1c7   :  { %v4509_v34 = vpop.f32.mrf.mxu1  ;;  %v3464_v6 = vpop.eup %3463  ;;  %3489 = vrcp.f32 %v1566_v53  ;;  %v1563_v50 = vadd.f32 1.0, %v3462_v19  ;;  %3114 = vmatprep.mubr.f32.mxu1 %v1941_v12  ;;  %v2740_v42 = vmul.f32 -1.442695, %v4828_v45  ;;  %v4830_v12 = vld [vmem:[#allocation40_spill] sm:$0xff] }
 0x1c8   :  { %2208 = vmatprep.mubr.f32.mxu0 %v1931_v51  ;;  %v3466_v15 = vpop.eup %3465  ;;  %3491 = vrcp.f32 %v1550_v14  ;;  %v1552_v0 = vadd.f32 1.0, %v3464_v6  ;;  %3115 = vmatmul.mubr.f32.gmra.mxu1 %v1944_v7  ;;  %v2736_v51 = vmul.f32 -1.442695, %v4829_v61  ;;  %v4831_v7 = vld [vmem:[#allocation45_spill] sm:$0xff] }
 0x1c9   :  { %v4513_v22 = vpop.f32.mrf.mxu1  ;;  %2209 = vmatmul.mubr.f32.gmra.mxu0 %v1930_v40  ;;  %v3468_v48 = vpop.eup %3467  ;;  %3493 = vrcp.f32 %v1563_v50  ;;  %v1572_v2 = vadd.f32 1.0, %v3466_v15  ;;  %v1564_v40 = vadd.f32 1.0, %v4830_v12  ;;  %v1568_v6 = vadd.f32 1.0, %v4831_v7  ;;  %v4832_v15 = vld [vmem:[#allocation35_spill] sm:$0xff] }
 0x1ca   :  { %v3470_v39 = vpop.eup %3469  ;;  %3495 = vrcp.f32 %v1552_v0  ;;  %v1553_v20 = vadd.f32 1.0, %v3468_v48  ;;  %v2743_v0 = vmul.f32 -1.442695, %v4832_v15 }
 0x1cb   :  { %v4515_v36 = vpop.f32.mrf.mxu1  ;;  %v3472_v37 = vpop.eup %3471  ;;  %3497 = vrcp.f32 %v1572_v2  ;;  %v1569_v4 = vadd.f32 1.0, %v3470_v39 }
 0x1cc   :  { %v3474_v21 = vpop.eup %3473  ;;  %3499 = vrcp.f32 %v1553_v20  ;;  %v1555_v54 = vadd.f32 1.0, %v3472_v37  ;;  %v4539_v2 = vpop.f32.mrf.mxu0  ;;  %v4833_v37 = vld [vmem:[#allocation29_spill] sm:$0xff] }
 0x1cd   :  { %v4519_v56 = vpop.f32.mrf.mxu1  ;;  %v3476_v10 = vpop.eup %3475  ;;  %3501 = vrcp.f32 %v1569_v4  ;;  %v1578_v8 = vadd.f32 1.0, %v3474_v21  ;;  %v2739_v4 = vmul.f32 -1.442695, %v4833_v37 }
 0x1ce   :  { %v3478_v24 = vpop.eup %3477  ;;  %3503 = vrcp.f32 %v1555_v54  ;;  %v1556_v27 = vadd.f32 1.0, %v3476_v10 }
 0x1cf   :  { %v4521_v59 = vpop.f32.mrf.mxu1  ;;  %v3480_v31 = vpop.eup %3479  ;;  %3505 = vrcp.f32 %v1578_v8  ;;  %v1575_v23 = vadd.f32 1.0, %v3478_v24 }
 0x1d0   :  { %v3482_v13 = vpop.eup %3481  ;;  %3507 = vrcp.f32 %v1556_v27  ;;  %v1558_v33 = vadd.f32 1.0, %v3480_v31  ;;  %v4834_v31 = vld [vmem:[#allocation43_spill] sm:$0xff] }
 0x1d1   :  { %v4525_v17 = vpop.f32.mrf.mxu1  ;;  %v3484_v49 = vpop.eup %3483  ;;  %3509 = vrcp.f32 %v1575_v23  ;;  %v1584_v3 = vadd.f32 1.0, %v3482_v13  ;;  %v1567_v23 = vadd.f32 1.0, %v4834_v31 }
 0x1d2   :  { %v3486_v11 = vpop.eup %3485  ;;  %3511 = vrcp.f32 %v1558_v33  ;;  %v1559_v18 = vadd.f32 1.0, %v3484_v49 }
 0x1d3   :  { %v4527_v29 = vpop.f32.mrf.mxu1  ;;  %v3488_v1 = vpop.eup %3487  ;;  %3513 = vrcp.f32 %v1584_v3  ;;  %v1581_v30 = vadd.f32 1.0, %v3486_v11 }
 0x1d4   :  { %v3490_v53 = vpop.eup %3489  ;;  %3515 = vrcp.f32 %v1559_v18  ;;  %v1837_v21 = vmul.f32 %v3488_v1, %v4812_v46  ;;  %v4835_v46 = vld [vmem:[#allocation49_spill] sm:$0xff]  ;;  %v1182_v11 = vpop.f32.mrf.mxu0 }
 0x1d5   :  { %v4530_v47 = vpop.f32.mrf.mxu1  ;;  %v3492_v14 = vpop.eup %3491  ;;  %3517 = vrcp.f32 %v1581_v30  ;;  %v1854_v8 = vmul.f32 %v3490_v53, %v4813_v57  ;;  %v1571_v3 = vadd.f32 1.0, %v4835_v46  ;;  %v4836_v18 = vld [vmem:[#allocation33_spill] sm:$0xff] }
 0x1d6   :  { %v3494_v50 = vpop.eup %3493  ;;  %3519 = vpow2.f32 %v2740_v42  ;;  %v1838_v48 = vmul.f32 %v3492_v14, %v4814_v32  ;;  %v1933_v33 = vmul.f32 %v1837_v21, %v4509_v34  ;;  %v2742_v1 = vmul.f32 -1.442695, %v4836_v18 }
 0x1d7   :  { %v4534_v19 = vpop.f32.mrf.mxu1  ;;  %v3496_v20 = vpop.eup %3495  ;;  %3521 = vpow2.f32 %v2736_v51  ;;  %v1851_v54 = vmul.f32 %v3494_v50, %v4815_v28  ;;  %v1950_v57 = vmul.f32 %v4511_v35, %v1854_v8  ;;  %v4839_v8 = vld [vmem:[#allocation17_spill] sm:$0xff] }
 0x1d8   :  { %v3498_v10 = vpop.eup %3497  ;;  %3523 = vrcp.f32 %v1564_v40  ;;  %v1934_v24 = vmul.f32 %v1838_v48, %v4513_v22  ;;  %v3048_v50 = vpop.f32.mrf.mxu0 }
 0x1d9   :  { %v4541_v39 = vpop.f32.mrf.mxu1  ;;  %v3500_v32 = vpop.eup %3499  ;;  %3525 = vrcp.f32 %v1568_v6  ;;  %v1947_v13 = vmul.f32 %v1851_v54, %v4517_v55  ;;  %v1840_v55 = vmul.f32 %v3496_v20, %v4816_v26  ;;  %v1860_v30 = vmul.f32 %v3498_v10, %v4817_v41  ;;  %v4837_v26 = vld [vmem:[#allocation64_spill] sm:$0xff] }
 0x1da   :  { %v3502_v49 = vpop.eup %3501  ;;  %3527 = vpow2.f32 %v2743_v0  ;;  %v1841_v28 = vmul.f32 %v3500_v32, %v4818_v5  ;;  %2213 = vmatprep.mubr.f32.mxu0 %v1934_v24  ;;  %v1574_v7 = vadd.f32 1.0, %v4837_v26  ;;  %v4838_v0 = vld [vmem:[#allocation47_spill] sm:$0xff] }
 0x1db   :  { %v4548_v27 = vpop.f32.mrf.mxu1  ;;  %v3504_v42 = vpop.eup %3503  ;;  %3529 = vpow2.f32 %v2739_v4  ;;  %v1857_v34 = vmul.f32 %v3502_v49, %v4819_v9  ;;  %3117 = vmatprep.mubr.f32.mxu1 %v1947_v13  ;;  %2214 = vmatmul.mubr.f32.gmra.mxu0 %v1933_v33  ;;  %v1936_v40 = vmul.f32 %v1840_v55, %v4515_v36  ;;  %v1956_v6 = vmul.f32 %v4523_v52, %v1860_v30  ;;  %v4840_v24 = vld [vmem:[#allocation55_spill] sm:$0xff]  ;;  %v4842_v49 = vld [vmem:[#allocation62_spill] sm:$0xff]  ;;  %v4844_v30 = vld [vmem:[#allocation56_spill] sm:$0xff] }
 0x1dc   :  { %v3506_v51 = vpop.eup %3505  ;;  %3118 = vmatmul.mubr.f32.gmra.mxu1 %v1950_v57  ;;  %v1937_v5 = vmul.f32 %v1841_v28, %v4519_v56  ;;  %3531 = vrcp.f32 %v1567_v23  ;;  %v1570_v48 = vadd.f32 1.0, %v4838_v0  ;;  %v1850_v32 = vmul.f32 %v4840_v24, %v4839_v8  ;;  %v1192_v13 = vpop.f32.mrf.mxu0 }
 0x1dd   :  { %v4556_v22 = vpop.f32.mrf.mxu1  ;;  %v3508_v53 = vpop.eup %3507  ;;  %v1953_v12 = vmul.f32 %v1857_v34, %v1172_v43  ;;  %3533 = vrcp.f32 %v1571_v3  ;;  %v1843_v43 = vmul.f32 %v3504_v42, %v4820_v38  ;;  %v1866_v4 = vmul.f32 %v3506_v51, %v4821_v16  ;;  %v4843_v51 = vld [vmem:[#allocation19_spill] sm:$0xff] }
 0x1de   :  { %v3510_v14 = vpop.eup %3509  ;;  %v1844_v9 = vmul.f32 %v3508_v53, %v4822_v25  ;;  %2218 = vmatprep.mubr.f32.mxu0 %v1937_v5  ;;  %3535 = vpow2.f32 %v2742_v1  ;;  %v1573_v46 = vadd.f32 1.0, %v4842_v49  ;;  %v1853_v5 = vmul.f32 %v4844_v30, %v4843_v51 }
 0x1df   :  { %v4563_v35 = vpop.f32.mrf.mxu1  ;;  %v3512_v56 = vpop.eup %3511  ;;  %v1863_v36 = vmul.f32 %v3510_v14, %v4823_v60  ;;  %3120 = vmatprep.mubr.f32.mxu1 %v1953_v12  ;;  %2219 = vmatmul.mubr.f32.gmra.mxu0 %v1936_v40  ;;  %v1939_v10 = vmul.f32 %v1843_v43, %v4521_v59  ;;  %3537 = vrcp.f32 %v1574_v7  ;;  %v4841_v60 = vld [vmem:[#allocation66_spill] sm:$0xff]  ;;  %v1962_v16 = vmul.f32 %v4539_v2, %v1866_v4  ;;  %v4845_v12 = vld [vmem:[#allocation16_spill] sm:$0xff] }
 0x1e0   :  { %v3514_v20 = vpop.eup %3513  ;;  %3121 = vmatmul.mubr.f32.gmra.mxu1 %v1956_v6  ;;  %v1940_v25 = vmul.f32 %v1844_v9, %v4525_v17  ;;  %v1577_v31 = vadd.f32 1.0, %v4841_v60  ;;  %3539 = vrcp.f32 %v1570_v48  ;;  %v1846_v59 = vmul.f32 %v3512_v56, %v4824_v62  ;;  %v4848_v48 = vld [vmem:[#allocation18_spill] sm:$0xff] }
 0x1e1   :  { %v4569_v41 = vpop.f32.mrf.mxu1  ;;  %v3516_v21 = vpop.eup %3515  ;;  %v1959_v54 = vmul.f32 %v1863_v36, %v1182_v11  ;;  %v1872_v57 = vmul.f32 %v3514_v20, %v4825_v63  ;;  %v1946_v2 = vmul.f32 %v1850_v32, %v4541_v39 }
 0x1e2   :  { %v3518_v38 = vpop.eup %3517  ;;  %v1847_v23 = vmul.f32 %v3516_v21, %v4826_v58  ;;  %2223 = vmatprep.mubr.f32.mxu0 %v1940_v25  ;;  %v1942_v55 = vmul.f32 %v1846_v59, %v4527_v29  ;;  %3541 = vrcp.f32 %v1577_v31  ;;  %v1949_v29 = vmul.f32 %v1853_v5, %v4556_v22 }
 0x1e3   :  { %v4576_v52 = vpop.f32.mrf.mxu1  ;;  %v3520_v33 = vpop.eup %3519  ;;  %v1869_v3 = vmul.f32 %v3518_v38, %v4827_v44  ;;  %3123 = vmatprep.mubr.f32.mxu1 %v1959_v54  ;;  %2224 = vmatmul.mubr.f32.gmra.mxu0 %v1939_v10  ;;  %v1968_v44 = vmul.f32 %v3048_v50, %v1872_v57  ;;  %3543 = vrcp.f32 %v1573_v46  ;;  %v4847_v50 = vld [vmem:[#allocation21_spill] sm:$0xff]  ;;  %v4850_v10 = vld [vmem:[#allocation20_spill] sm:$0xff] }
 0x1e4   :  { %v3522_v28 = vpop.eup %3521  ;;  %3124 = vmatmul.mubr.f32.gmra.mxu1 %v1962_v16  ;;  %v1943_v58 = vmul.f32 %v1847_v23, %v4530_v47  ;;  %v1580_v62 = vadd.f32 1.0, %v3520_v33  ;;  %v4846_v47 = vld [vmem:[#allocation52_spill] sm:$0xff]  ;;  %v4851_v23 = vld [vmem:[#allocation25_spill] sm:$0xff] }
 0x1e5   :  { %v949_v17 = vpop.f32.mrf.mxu1  ;;  %v3524_v42 = vpop.eup %3523  ;;  %v1965_v1 = vmul.f32 %v1869_v3, %v1192_v13  ;;  %v1849_v40 = vmul.f32 %v4846_v47, %v4845_v12  ;;  %v1576_v39 = vadd.f32 1.0, %v3522_v28  ;;  %v4853_v3 = vld [vmem:[#allocation27_spill] sm:$0xff] }
 0x1e6   :  { %v3526_v34 = vpop.eup %3525  ;;  %2228 = vmatprep.mubr.f32.mxu0 %v1943_v58  ;;  %3545 = vrcp.f32 %v1580_v62  ;;  %v1852_v43 = vmul.f32 %v3524_v42, %v4848_v48 }
 0x1e7   :  { %v4590_v11 = vpop.f32.mrf.mxu1  ;;  %v3528_v53 = vpop.eup %3527  ;;  %3126 = vmatprep.mubr.f32.mxu1 %v1965_v1  ;;  %2229 = vmatmul.mubr.f32.gmra.mxu0 %v1942_v55  ;;  %v1945_v26 = vmul.f32 %v1849_v40, %v4534_v19  ;;  %v1856_v56 = vmul.f32 %v3526_v34, %v4847_v50  ;;  %3547 = vrcp.f32 %v1576_v39  ;;  %v4849_v19 = vld [vmem:[#allocation23_spill] sm:$0xff] }
 0x1e8   :  { %v3530_v14 = vpop.eup %3529  ;;  %3127 = vmatmul.mubr.f32.gmra.mxu1 %v1968_v44  ;;  %2233 = vmatprep.mubr.f32.mxu0 %v1946_v2  ;;  %v1583_v6 = vadd.f32 1.0, %v3528_v53  ;;  %v1948_v22 = vmul.f32 %v1852_v43, %v4548_v27  ;;  %v4852_v27 = vld [vmem:[#allocation22_spill] sm:$0xff] }
 0x1e9   :  { %v955_v63 = vpop.f32.mrf.mxu1  ;;  %v3532_v9 = vpop.eup %3531  ;;  %v1579_v36 = vadd.f32 1.0, %v3530_v14  ;;  %v1952_v4 = vmul.f32 %v1856_v56, %v4569_v41 }
 0x1ea   :  { %v3534_v0 = vpop.eup %3533  ;;  %3549 = vrcp.f32 %v1583_v6  ;;  %v1855_v8 = vmul.f32 %v3532_v9, %v4850_v10 }
 0x1eb   :  { %v959_v7 = vpop.f32.mrf.mxu1  ;;  %2234 = vmatmul.mubr.f32.gmra.mxu0 %v1945_v26  ;;  %v3536_v20 = vpop.eup %3535  ;;  %v1859_v21 = vmul.f32 %v3534_v0, %v4849_v19  ;;  %3551 = vrcp.f32 %v1579_v36 }
 0x1ec   :  { %2238 = vmatprep.mubr.f32.mxu0 %v1949_v29  ;;  %v3538_v54 = vpop.eup %3537  ;;  %v1582_v24 = vadd.f32 1.0, %v3536_v20  ;;  %v1951_v60 = vmul.f32 %v1855_v8, %v4563_v35 }
 0x1ed   :  { %v961_v25 = vpop.f32.mrf.mxu1  ;;  %v3540_v32 = vpop.eup %3539  ;;  %v1955_v38 = vmul.f32 %v1859_v21, %v949_v17  ;;  %v1862_v41 = vmul.f32 %v3538_v54, %v4851_v23  ;;  %v4854_v17 = vld [vmem:[#allocation24_spill] sm:$0xff] }
 0x1ee   :  { %v1858_v13 = vmul.f32 %v3540_v32, %v4852_v27  ;;  %3553 = vrcp.f32 %v1582_v24 }
 0x1ef   :  { %2239 = vmatmul.mubr.f32.gmra.mxu0 %v1948_v22  ;;  %v965_v31 = vpop.f32.mrf.mxu1  ;;  %v3542_v16 = vpop.eup %3541  ;;  %v1958_v49 = vmul.f32 %v1862_v41, %v955_v63 }
 0x1f0   :  { %2243 = vmatprep.mubr.f32.mxu0 %v1952_v4  ;;  %v3544_v33 = vpop.eup %3543  ;;  %v1954_v46 = vmul.f32 %v1858_v13, %v4576_v52  ;;  %v1865_v28 = vmul.f32 %v3542_v16, %v4853_v3 }
 0x1f1   :  { %v967_v59 = vpop.f32.mrf.mxu1  ;;  %v1861_v58 = vmul.f32 %v3544_v33, %v4854_v17 }
 0x1f2   :  { %v1961_v2 = vmul.f32 %v1865_v28, %v961_v25 }
 0x1f3   :  { %2244 = vmatmul.mubr.f32.gmra.mxu0 %v1951_v60  ;;  %v3546_v57 = vpop.eup %3545  ;;  %v1957_v42 = vmul.f32 %v1861_v58, %v4590_v11  ;;  %v971_v1 = vpop.f32.mrf.mxu1 }
 0x1f4   :  { %2248 = vmatprep.mubr.f32.mxu0 %v1955_v38  ;;  %v3548_v35 = vpop.eup %3547  ;;  %v1868_v55 = vmul.f32 %v3546_v57, %v4828_v45 }
 0x1f5   :  { %v1864_v62 = vmul.f32 %v3548_v35, %v4829_v61  ;;  %v973_v30 = vpop.f32.mrf.mxu1 }
 0x1f6   :  { %v1964_v44 = vmul.f32 %v1868_v55, %v967_v59 }
 0x1f7   :  { %2249 = vmatmul.mubr.f32.gmra.mxu0 %v1954_v46  ;;  %v3550_v34 = vpop.eup %3549  ;;  %v1960_v51 = vmul.f32 %v1864_v62, %v959_v7 }
 0x1f8   :  { %2253 = vmatprep.mubr.f32.mxu0 %v1958_v49  ;;  %v3552_v52 = vpop.eup %3551  ;;  %v1871_v5 = vmul.f32 %v3550_v34, %v4832_v15 }
 0x1f9   :  { %v1867_v63 = vmul.f32 %v3552_v52, %v4833_v37 }
 0x1fa   :  { %v1967_v11 = vmul.f32 %v1871_v5, %v973_v30 }
 0x1fb   :  { %2254 = vmatmul.mubr.f32.gmra.mxu0 %v1957_v42  ;;  %v3554_v53 = vpop.eup %3553  ;;  %v1963_v12 = vmul.f32 %v1867_v63, %v965_v31 }
 0x1fc   :  { %2258 = vmatprep.mubr.f32.mxu0 %v1961_v2  ;;  %v1870_v45 = vmul.f32 %v3554_v53, %v4836_v18 }
 0x1fe   :  { %v1966_v61 = vmul.f32 %v1870_v45, %v971_v1 }
 0x1ff   :  { %2259 = vmatmul.mubr.f32.gmra.mxu0 %v1960_v51 }
 0x200   :  { %2263 = vmatprep.mubr.f32.mxu0 %v1964_v44 }
 0x203   :  { %2264 = vmatmul.mubr.f32.gmra.mxu0 %v1963_v12 }
 0x204   :  { %2268 = vmatprep.mubr.f32.mxu0 %v1967_v11 }
 0x207   :  { %2269 = vmatmul.mubr.f32.gmra.mxu0 %v1966_v61 }
 0x23c   :  { %v3083_v40 = vpop.f32.mrf.mxu1 }
 0x23d   :  { %v2115_v47 = vpop.f32.mrf.mxu0 }
 0x23e   :  { %v2340_v14 = vpop.f32.mrf.mxu1 }
 0x23f   :  { %v2117_v39 = vpop.f32.mrf.mxu0  ;;  %v2341_v26 = vadd.f32 %v2340_v14, %v2115_v47 }
 0x240   :  { %v3086_v7 = vpop.f32.mrf.mxu1 }
 0x241   :  { %v2120_v29 = vpop.f32.mrf.mxu0  ;;  %2598 = vst [vmem:[#allocation11] sm:$0xff] %v2341_v26 }
 0x242   :  { %v2346_v15 = vadd.f32 %v3083_v40, %v2120_v29  ;;  %v2350_v9 = vpop.f32.mrf.mxu1 }
 0x243   :  { %v2122_v37 = vpop.f32.mrf.mxu0 }
 0x244   :  { %2599 = vst [vmem:[#allocation11 + $0x8] sm:$0xff] %v2346_v15  ;;  %v3089_v18 = vpop.f32.mrf.mxu1 }
 0x245   :  { %v2125_v6 = vpop.f32.mrf.mxu0 }
 0x246   :  { %v2351_v50 = vadd.f32 %v2350_v9, %v2125_v6  ;;  %v2360_v36 = vpop.f32.mrf.mxu1 }
 0x247   :  { %v2127_v56 = vpop.f32.mrf.mxu0 }
 0x248   :  { %2600 = vst [vmem:[#allocation11 + $0x10] sm:$0xff] %v2351_v50  ;;  %v3092_v25 = vpop.f32.mrf.mxu1 }
 0x249   :  { %v2130_v0 = vpop.f32.mrf.mxu0 }
 0x24a   :  { %v2356_v48 = vadd.f32 %v3086_v7, %v2130_v0  ;;  %v2370_v10 = vpop.f32.mrf.mxu1 }
 0x24b   :  { %v2132_v43 = vpop.f32.mrf.mxu0 }
 0x24c   :  { %2601 = vst [vmem:[#allocation11 + $0x18] sm:$0xff] %v2356_v48 }
 0x24d   :  { %v2135_v20 = vpop.f32.mrf.mxu0 }
 0x24e   :  { %v2361_v4 = vadd.f32 %v2360_v36, %v2135_v20 }
 0x24f   :  { %v2137_v22 = vpop.f32.mrf.mxu0 }
 0x250   :  { %2602 = vst [vmem:[#allocation11 + $0x20] sm:$0xff] %v2361_v4 }
 0x251   :  { %v2140_v19 = vpop.f32.mrf.mxu0 }
 0x252   :  { %v2366_v21 = vadd.f32 %v3089_v18, %v2140_v19 }
 0x253   :  { %v2142_v54 = vpop.f32.mrf.mxu0 }
 0x254   :  { %2603 = vst [vmem:[#allocation11 + $0x28] sm:$0xff] %v2366_v21 }
 0x255   :  { %v2145_v8 = vpop.f32.mrf.mxu0 }
 0x256   :  { %v2371_v24 = vadd.f32 %v2370_v10, %v2145_v8 }
 0x257   :  { %v2147_v32 = vpop.f32.mrf.mxu0 }
 0x258   :  { %2604 = vst [vmem:[#allocation11 + $0x30] sm:$0xff] %v2371_v24 }
 0x259   :  { %v2150_v38 = vpop.f32.mrf.mxu0 }
 0x25a   :  { %v2376_v60 = vadd.f32 %v3092_v25, %v2150_v38 }
 0x25b   :  { %v2152_v31 = vpop.f32.mrf.mxu0 }
 0x25c   :  { %2605 = vst [vmem:[#allocation11 + $0x38] sm:$0xff] %v2376_v60  ;;  %v3095_v41 = vpop.f32.mrf.mxu1 }
 0x25d   :  { %v2155_v23 = vpop.f32.mrf.mxu0 }
 0x25e   :  { %v2380_v27 = vpop.f32.mrf.mxu1 }
 0x25f   :  { %v2157_v16 = vpop.f32.mrf.mxu0  ;;  %v2381_v33 = vadd.f32 %v2380_v27, %v2155_v23 }
 0x260   :  { %v3098_v46 = vpop.f32.mrf.mxu1 }
 0x261   :  { %v2160_v13 = vpop.f32.mrf.mxu0  ;;  %2606 = vst [vmem:[#allocation11 + $0x40] sm:$0xff] %v2381_v33 }
 0x262   :  { %v2386_v49 = vadd.f32 %v3095_v41, %v2160_v13  ;;  %v2390_v3 = vpop.f32.mrf.mxu1 }
 0x263   :  { %v2162_v59 = vpop.f32.mrf.mxu0 }
 0x264   :  { %2607 = vst [vmem:[#allocation11 + $0x48] sm:$0xff] %v2386_v49  ;;  %v3101_v58 = vpop.f32.mrf.mxu1 }
 0x265   :  { %v2165_v28 = vpop.f32.mrf.mxu0 }
 0x266   :  { %v2391_v57 = vadd.f32 %v2390_v3, %v2165_v28  ;;  %v2400_v1 = vpop.f32.mrf.mxu1 }
 0x267   :  { %v2167_v17 = vpop.f32.mrf.mxu0 }
 0x268   :  { %2608 = vst [vmem:[#allocation11 + $0x50] sm:$0xff] %v2391_v57  ;;  %v3104_v52 = vpop.f32.mrf.mxu1 }
 0x269   :  { %v2170_v35 = vpop.f32.mrf.mxu0 }
 0x26a   :  { %v2396_v2 = vadd.f32 %v3098_v46, %v2170_v35  ;;  %v2410_v5 = vpop.f32.mrf.mxu1 }
 0x26b   :  { %v2172_v42 = vpop.f32.mrf.mxu0 }
 0x26c   :  { %2609 = vst [vmem:[#allocation11 + $0x58] sm:$0xff] %v2396_v2 }
 0x26d   :  { %v2175_v55 = vpop.f32.mrf.mxu0 }
 0x26e   :  { %v2401_v34 = vadd.f32 %v2400_v1, %v2175_v55 }
 0x26f   :  { %v2177_v62 = vpop.f32.mrf.mxu0 }
 0x270   :  { %2610 = vst [vmem:[#allocation11 + $0x60] sm:$0xff] %v2401_v34 }
 0x271   :  { %v2180_v44 = vpop.f32.mrf.mxu0 }
 0x272   :  { %v2406_v51 = vadd.f32 %v3101_v58, %v2180_v44 }
 0x273   :  { %v2182_v30 = vpop.f32.mrf.mxu0 }
 0x274   :  { %2611 = vst [vmem:[#allocation11 + $0x68] sm:$0xff] %v2406_v51 }
 0x275   :  { %v2185_v63 = vpop.f32.mrf.mxu0 }
 0x276   :  { %v2411_v53 = vadd.f32 %v2410_v5, %v2185_v63 }
 0x277   :  { %v2187_v11 = vpop.f32.mrf.mxu0 }
 0x278   :  { %2612 = vst [vmem:[#allocation11 + $0x70] sm:$0xff] %v2411_v53 }
 0x279   :  { %v2190_v12 = vpop.f32.mrf.mxu0 }
 0x27a   :  { %v2416_v45 = vadd.f32 %v3104_v52, %v2190_v12 }
 0x27b   :  { %v2192_v61 = vpop.f32.mrf.mxu0 }
 0x27c   :  { %2613 = vst [vmem:[#allocation11 + $0x78] sm:$0xff] %v2416_v45  ;;  %v3107_v40 = vpop.f32.mrf.mxu1 }
 0x27d   :  { %v2195_v47 = vpop.f32.mrf.mxu0 }
 0x27e   :  { %v2420_v14 = vpop.f32.mrf.mxu1 }
 0x27f   :  { %v2197_v39 = vpop.f32.mrf.mxu0  ;;  %v2421_v29 = vadd.f32 %v2420_v14, %v2195_v47 }
 0x280   :  { %v3110_v15 = vpop.f32.mrf.mxu1 }
 0x281   :  { %v2200_v26 = vpop.f32.mrf.mxu0  ;;  %2614 = vst [vmem:[#allocation11 + $0x80] sm:$0xff] %v2421_v29 }
 0x282   :  { %v2426_v7 = vadd.f32 %v3107_v40, %v2200_v26  ;;  %v2430_v9 = vpop.f32.mrf.mxu1 }
 0x283   :  { %v2202_v37 = vpop.f32.mrf.mxu0 }
 0x284   :  { %2615 = vst [vmem:[#allocation11 + $0x88] sm:$0xff] %v2426_v7  ;;  %v3113_v43 = vpop.f32.mrf.mxu1 }
 0x285   :  { %v2205_v6 = vpop.f32.mrf.mxu0 }
 0x286   :  { %v2431_v50 = vadd.f32 %v2430_v9, %v2205_v6  ;;  %v2440_v36 = vpop.f32.mrf.mxu1 }
 0x287   :  { %v2207_v56 = vpop.f32.mrf.mxu0 }
 0x288   :  { %2616 = vst [vmem:[#allocation11 + $0x90] sm:$0xff] %v2431_v50  ;;  %v3116_v25 = vpop.f32.mrf.mxu1 }
 0x289   :  { %v2210_v18 = vpop.f32.mrf.mxu0 }
 0x28a   :  { %v2436_v0 = vadd.f32 %v3110_v15, %v2210_v18  ;;  %v2450_v10 = vpop.f32.mrf.mxu1 }
 0x28b   :  { %v2212_v48 = vpop.f32.mrf.mxu0 }
 0x28c   :  { %2617 = vst [vmem:[#allocation11 + $0x98] sm:$0xff] %v2436_v0 }
 0x29b   :  { %v2215_v20 = vpop.f32.mrf.mxu0 }
 0x29c   :  { %v2441_v4 = vadd.f32 %v2440_v36, %v2215_v20  ;;  %v3119_v38 = vpop.f32.mrf.mxu1 }
 0x29d   :  { %v2217_v22 = vpop.f32.mrf.mxu0 }
 0x29e   :  { %2618 = vst [vmem:[#allocation11 + $0xa0] sm:$0xff] %v2441_v4  ;;  %v2460_v41 = vpop.f32.mrf.mxu1 }
 0x29f   :  { %v2220_v19 = vpop.f32.mrf.mxu0 }
 0x2a0   :  { %v2446_v21 = vadd.f32 %v3113_v43, %v2220_v19  ;;  %v3122_v33 = vpop.f32.mrf.mxu1 }
 0x2a1   :  { %v2222_v54 = vpop.f32.mrf.mxu0 }
 0x2a2   :  { %2619 = vst [vmem:[#allocation11 + $0xa8] sm:$0xff] %v2446_v21  ;;  %v2470_v3 = vpop.f32.mrf.mxu1 }
 0x2a3   :  { %v2225_v8 = vpop.f32.mrf.mxu0 }
 0x2a4   :  { %v2451_v24 = vadd.f32 %v2450_v10, %v2225_v8  ;;  %v3125_v58 = vpop.f32.mrf.mxu1 }
 0x2a5   :  { %v2227_v32 = vpop.f32.mrf.mxu0 }
 0x2a6   :  { %2620 = vst [vmem:[#allocation11 + $0xb0] sm:$0xff] %v2451_v24  ;;  %v2480_v1 = vpop.f32.mrf.mxu1 }
 0x2a7   :  { %v2230_v60 = vpop.f32.mrf.mxu0 }
 0x2a8   :  { %v2456_v31 = vadd.f32 %v3116_v25, %v2230_v60  ;;  %v3128_v52 = vpop.f32.mrf.mxu1 }
 0x2a9   :  { %v2232_v23 = vpop.f32.mrf.mxu0 }
 0x2aa   :  { %2621 = vst [vmem:[#allocation11 + $0xb8] sm:$0xff] %v2456_v31  ;;  %v2490_v5 = vpop.f32.mrf.mxu1 }
 0x2ab   :  { %v2235_v16 = vpop.f32.mrf.mxu0 }
 0x2ac   :  { %v2461_v27 = vadd.f32 %v2460_v41, %v2235_v16 }
 0x2ad   :  { %v2237_v13 = vpop.f32.mrf.mxu0 }
 0x2ae   :  { %2622 = vst [vmem:[#allocation11 + $0xc0] sm:$0xff] %v2461_v27 }
 0x2af   :  { %v2240_v49 = vpop.f32.mrf.mxu0 }
 0x2b0   :  { %v2466_v46 = vadd.f32 %v3119_v38, %v2240_v49 }
 0x2b1   :  { %v2242_v59 = vpop.f32.mrf.mxu0 }
 0x2b2   :  { %2623 = vst [vmem:[#allocation11 + $0xc8] sm:$0xff] %v2466_v46 }
 0x2b3   :  { %v2245_v28 = vpop.f32.mrf.mxu0 }
 0x2b4   :  { %v2471_v57 = vadd.f32 %v2470_v3, %v2245_v28 }
 0x2b5   :  { %v2247_v17 = vpop.f32.mrf.mxu0 }
 0x2b6   :  { %2624 = vst [vmem:[#allocation11 + $0xd0] sm:$0xff] %v2471_v57 }
 0x2b7   :  { %v2250_v35 = vpop.f32.mrf.mxu0 }
 0x2b8   :  { %v2476_v2 = vadd.f32 %v3122_v33, %v2250_v35 }
 0x2b9   :  { %v2252_v42 = vpop.f32.mrf.mxu0 }
 0x2ba   :  { %2625 = vst [vmem:[#allocation11 + $0xd8] sm:$0xff] %v2476_v2 }
 0x2bb   :  { %v2255_v55 = vpop.f32.mrf.mxu0 }
 0x2bc   :  { %v2481_v34 = vadd.f32 %v2480_v1, %v2255_v55 }
 0x2bd   :  { %v2257_v62 = vpop.f32.mrf.mxu0 }
 0x2be   :  { %2626 = vst [vmem:[#allocation11 + $0xe0] sm:$0xff] %v2481_v34 }
 0x2bf   :  { %v2260_v44 = vpop.f32.mrf.mxu0 }
 0x2c0   :  { %v2486_v51 = vadd.f32 %v3125_v58, %v2260_v44 }
 0x2c1   :  { %v2262_v30 = vpop.f32.mrf.mxu0 }
 0x2c2   :  { %2627 = vst [vmem:[#allocation11 + $0xe8] sm:$0xff] %v2486_v51 }
 0x2c3   :  { %v2265_v63 = vpop.f32.mrf.mxu0 }
 0x2c4   :  { %v2491_v53 = vadd.f32 %v2490_v5, %v2265_v63 }
 0x2c5   :  { %v2267_v11 = vpop.f32.mrf.mxu0 }
 0x2c6   :  { %2628 = vst [vmem:[#allocation11 + $0xf0] sm:$0xff] %v2491_v53 }
 0x2c7   :  { %v2270_v12 = vpop.f32.mrf.mxu0 }
 0x2c8   :  { %v2496_v45 = vadd.f32 %v3128_v52, %v2270_v12 }
 0x2c9   :  { %v2272_v61 = vpop.f32.mrf.mxu0 }
 0x2ca   :  { %2629 = vst [vmem:[#allocation11 + $0xf8] sm:$0xff] %v2496_v45 }
 0x2cb   :  { %3646 = shalt.err (!%p3643_p10)
}
 0x2cc   :  { %2641 = dma.vmem_to_hbm [thread:$0]  %s2636_s3, 4096, %s4627_s4, [#allocation5], %s3667_s25, %s3667_s25, %s3668_s26  }
 0x2cd   :  { %3661 = dma.done.wait [#allocation5], 4096  }
 0x2ce   :  { %3662 = vsyncadd [#allocation5], 4294963200 }
 0x2cf   :  { %2645 = vsyncpa [#allocation4], 1 }
 0x2d0   :  { %2646 = vsyncpa [#allocation7], 1 }
 0x2d1   :  { %2647 = vsyncpa [#allocation10], 1 }
 0x2d2   :  { %2648 = vsyncpa [#allocation5], 1 }

</bundles_post_ra>
